<compile_context>
chip_gen: v6e
topology: v6e:2x2x1
jax: 0.10.0
libtpu: 0.0.40
codegen_flags: <defaults>
</compile_context>

<pallas_src>
import jax
import jax.numpy as jnp
from jax.experimental import pallas as pl
from jax.experimental.pallas import tpu as pltpu

HIDDEN = 768  # bert-base embedding dim


# ----------------------------------------------------------------------------
# Kernel
# ----------------------------------------------------------------------------
def _fused_fc_kernel(x_ref, w_ref, b_ref, o_ref):
    # x arrives as f32 straight from HBM; cast to bf16 in-register (VPU work,
    # hidden under the MXU) so the dot runs on the fast bf16 MXU path with f32
    # accumulation.
    x = x_ref[...].astype(jnp.bfloat16)
    y = jnp.dot(x, w_ref[...], preferred_element_type=jnp.float32)
    o_ref[...] = (y + b_ref[...]).astype(o_ref.dtype)


# ----------------------------------------------------------------------------
# One-time parameter fusion (call at model init, NOT per forward)
# ----------------------------------------------------------------------------
def fuse_fc_params(w1, b1, w2, b2):
    """Collapse the two bias-ed Linear(768,768) layers (no nonlinearity between
    them) into a single affine map.  w1/w2 are stored [in, out] (PyTorch
    weight.T).  Returns (W_fused bf16 [768,768], b_fused f32 [1,768])."""
    w1 = w1.astype(jnp.float32)
    w2 = w2.astype(jnp.float32)
    b1 = b1.astype(jnp.float32)
    b2 = b2.astype(jnp.float32)
    w_fused = jnp.dot(w1, w2)                 # [768, 768]
    b_fused = jnp.dot(b1, w2) + b2            # [1, 768]
    return w_fused.astype(jnp.bfloat16), b_fused.astype(jnp.float32)


# ----------------------------------------------------------------------------
# Tiling
# ----------------------------------------------------------------------------
def _pick_batch_tile(B):
    """Pick an HBM/MXU-friendly batch tile.

    The batch is padded up to a multiple of 128, then the largest of
    {1024, 512, 256, 128} that divides the padded batch is chosen (bigger
    tiles amortise the ~0.35us per-step Pallas overhead on this HBM-bound
    kernel).  If that leaves a single grid step and the tile is >=256 rows,
    halve it so v7x's two TensorCores each get a full-height (>=128 row)
    chunk of work.
    """
    padded = ((B + 127) // 128) * 128
    tb = 128
    for cand in (1024, 512, 256):
        if padded % cand == 0:
            tb = cand
            break
    if padded // tb == 1 and tb >= 256:
        tb //= 2
    return tb


# ----------------------------------------------------------------------------
# Hot path: y = init_x @ W_fused + b_fused
# ----------------------------------------------------------------------------
def fact_embedder_fc(init_x, w_fused_bf16, b_fused_f32, *, tb=None,
                     out_dtype=jnp.float32):
    """Applies the fused fc of FactEmbedder to [B, 768] sentence embeddings."""
    B, D = init_x.shape
    assert D == HIDDEN
    assert w_fused_bf16.shape == (D, D)
    assert b_fused_f32.shape == (1, D)

    if tb is None:
        tb = _pick_batch_tile(B)
    assert tb % 8 == 0, "batch tile must respect the 8-sublane layout"

    n_steps = pl.cdiv(B, tb)
    B_pad = n_steps * tb
    x = init_x.astype(jnp.float32)
    if B_pad != B:
        x = jnp.pad(x, ((0, B_pad - B), (0, 0)))

    out_bytes = jnp.dtype(out_dtype).itemsize
    cost = pl.CostEstimate(
        flops=2 * B_pad * D * D,
        transcendentals=0,
        bytes_accessed=(B_pad * D * 4          # x (f32, read once)
                        + D * D * 2            # fused W (bf16)
                        + D * 4                # fused bias (f32)
                        + B_pad * D * out_bytes),
    )

    out = pl.pallas_call(
        _fused_fc_kernel,
        out_shape=jax.ShapeDtypeStruct((B_pad, D), out_dtype),
        grid_spec=pltpu.PrefetchScalarGridSpec(
            num_scalar_prefetch=0,
            grid=(n_steps,),
            in_specs=[
                pl.BlockSpec((tb, D), lambda i: (i, 0)),   # x tile (f32)
                pl.BlockSpec((D, D), lambda i: (0, 0)),    # fused W (resident, bf16)
                pl.BlockSpec((1, D), lambda i: (0, 0)),    # fused bias (f32)
            ],
            out_specs=pl.BlockSpec((tb, D), lambda i: (i, 0)),
        ),
        compiler_params=pltpu.CompilerParams(
            dimension_semantics=("parallel",),
        ),
        cost_estimate=cost,
    )(x, w_fused_bf16, b_fused_f32)

    if B_pad != B:
        out = out[:B]
    return out


# ----------------------------------------------------------------------------
# References
# ----------------------------------------------------------------------------
def reference_fc_f32(init_x, w1, b1, w2, b2):
    """Exact f32 two-layer reference (matches the PyTorch module math)."""
    h = init_x @ w1 + b1
    return h @ w2 + b2


def reference_fc_fused_bf16(init_x, w_fused_bf16, b_fused_f32):
    """Reference using the same fusion + in-kernel bf16 casts as the kernel."""
    x_bf16 = init_x.astype(jnp.bfloat16)
    y = jnp.dot(x_bf16, w_fused_bf16, preferred_element_type=jnp.float32)
    return y + b_fused_f32


# ----------------------------------------------------------------------------
# Demo / self-test
# ----------------------------------------------------------------------------
if __name__ == "__main__":
    key = jax.random.PRNGKey(0)
    k_x, k_w1, k_b1, k_w2, k_b2 = jax.random.split(key, 5)

    B = 32  # small batch of "sentences" (padded internally to a 128-row tile)

    # TODO(synk): synthesize the 768-d embeddings SentenceTransformer.encode()
    # would produce (pretrained tokenizer + BERT has no Pallas equivalent).
    init_x = jax.random.normal(k_x, (B, HIDDEN), dtype=jnp.float32)

    # Deterministic parameter init mimicking nn.Linear's uniform(-1/sqrt(in), 1/sqrt(in)).
    bound = 1.0 / jnp.sqrt(jnp.float32(HIDDEN))
    w1 = jax.random.uniform(k_w1, (HIDDEN, HIDDEN), jnp.float32, -bound, bound)
    b1 = jax.random.uniform(k_b1, (1, HIDDEN), jnp.float32, -bound, bound)
    w2 = jax.random.uniform(k_w2, (HIDDEN, HIDDEN), jnp.float32, -bound, bound)
    b2 = jax.random.uniform(k_b2, (1, HIDDEN), jnp.float32, -bound, bound)

    # One-time fusion (model-init time) -- NOT on the per-forward hot path.
    w_fused_bf16, b_fused_f32 = fuse_fc_params(w1, b1, w2, b2)
    w_fused_bf16 = jax.block_until_ready(w_fused_bf16)
    b_fused_f32 = jax.block_until_ready(b_fused_f32)

    out = fact_embedder_fc(init_x, w_fused_bf16, b_fused_f32)
    out = jax.block_until_ready(out)
    assert out.shape == (B, HIDDEN)
    assert out.dtype == jnp.float32

    # Tight check against a reference using identical fusion + bf16 casts.
    ref_bf16 = reference_fc_fused_bf16(init_x, w_fused_bf16, b_fused_f32)
    assert jnp.allclose(out, ref_bf16, atol=1e-3, rtol=1e-3)

    # Looser sanity check against the exact f32 two-linear PyTorch-equivalent
    # math (bf16 weights/activations introduce ~1e-3-scale differences).
    ref_f32 = reference_fc_f32(init_x, w1, b1, w2, b2)
    assert jnp.allclose(out, ref_f32, atol=5e-2, rtol=5e-2)

    # Also exercise a non-multiple-of-16 batch (padding path) once.
    odd_x = jax.random.normal(k_x, (13, HIDDEN), dtype=jnp.float32)
    odd_out = jax.block_until_ready(
        fact_embedder_fc(odd_x, w_fused_bf16, b_fused_f32))
    assert odd_out.shape == (13, HIDDEN)
    odd_ref = reference_fc_fused_bf16(odd_x, w_fused_bf16, b_fused_f32)
    assert jnp.allclose(odd_out, odd_ref, atol=1e-3, rtol=1e-3)

    print("KERNEL_OK")
</pallas_src>

<mosaic_0001>
module attributes {stable_mosaic.version = 11 : i64} {
  func.func @_fused_fc_kernel(%arg0: i32, %arg1: memref<128x768xf32, #tpu.memory_space<vmem>>, %arg2: memref<768x768xbf16, #tpu.memory_space<vmem>>, %arg3: memref<1x768xf32, #tpu.memory_space<vmem>>, %arg4: memref<128x768xf32, #tpu.memory_space<vmem>>) attributes {dimension_semantics = [#tpu.dimension_semantics<parallel>], iteration_bounds = array<i64: 1>, scalar_prefetch = 0 : i64, scratch_operands = 0 : i64, tpu.core_type = #tpu.core_type<tc>, window_params = [{transform_indices = @transform_0, window_bounds = array<i64: 128, 768>}, {pipeline_mode = #tpu.pipeline_mode<synchronous>, transform_indices = @transform_1, window_bounds = array<i64: 768, 768>}, {pipeline_mode = #tpu.pipeline_mode<synchronous>, transform_indices = @transform_2, window_bounds = array<i64: 1, 768>}, {transform_indices = @transform_3, window_bounds = array<i64: 128, 768>}]} {
    %c0 = arith.constant 0 : index
    %c0_0 = arith.constant 0 : index
    %0 = vector.load %arg1[%c0, %c0_0] : memref<128x768xf32, #tpu.memory_space<vmem>>, vector<128x768xf32>
    %1 = arith.truncf %0 : vector<128x768xf32> to vector<128x768xbf16>
    %c0_1 = arith.constant 0 : index
    %c0_2 = arith.constant 0 : index
    %2 = vector.load %arg2[%c0_1, %c0_2] : memref<768x768xbf16, #tpu.memory_space<vmem>>, vector<768x768xbf16>
    %cst = arith.constant dense<0.000000e+00> : vector<128x768xf32>
    %3 = tpu.matmul %1, %2, %cst {dimension_numbers = #tpu.dot_dimension_numbers<[1], [0], [0], [1], [0, 0, 1, 1], [], []>} : vector<128x768xbf16>, vector<768x768xbf16>, vector<128x768xf32> -> vector<128x768xf32>
    %c0_3 = arith.constant 0 : index
    %c0_4 = arith.constant 0 : index
    %4 = vector.load %arg3[%c0_3, %c0_4] : memref<1x768xf32, #tpu.memory_space<vmem>>, vector<1x768xf32>
    %5 = vector.broadcast %4 : vector<1x768xf32> to vector<128x768xf32>
    %6 = arith.addf %3, %5 : vector<128x768xf32>
    %c0_5 = arith.constant 0 : index
    %c0_6 = arith.constant 0 : index
    %7 = vector.load %arg4[%c0_5, %c0_6] : memref<128x768xf32, #tpu.memory_space<vmem>>, vector<128x768xf32>
    tpu.vector_store %arg4[%c0_5, %c0_6], %6 {strides = array<i32>} : memref<128x768xf32, #tpu.memory_space<vmem>>, vector<128x768xf32>,
    return
  }
  func.func @transform_0(%arg0: i32) -> (i32, i32) {
    %c0_i32 = arith.constant 0 : i32
    %c0_i32_0 = arith.constant 0 : i32
    return %arg0, %c0_i32 : i32, i32
  }
  func.func @transform_1(%arg0: i32) -> (i32, i32) {
    %c0_i32 = arith.constant 0 : i32
    %c0_i32_0 = arith.constant 0 : i32
    %c0_i32_1 = arith.constant 0 : i32
    return %c0_i32, %c0_i32_0 : i32, i32
  }
  func.func @transform_2(%arg0: i32) -> (i32, i32) {
    %c0_i32 = arith.constant 0 : i32
    %c0_i32_0 = arith.constant 0 : i32
    %c0_i32_1 = arith.constant 0 : i32
    return %c0_i32, %c0_i32_0 : i32, i32
  }
  func.func @transform_3(%arg0: i32) -> (i32, i32) {
    %c0_i32 = arith.constant 0 : i32
    %c0_i32_0 = arith.constant 0 : i32
    return %arg0, %c0_i32 : i32, i32
  }
}

</mosaic_0001>

<bundles_post_ra>
// kernel: tpu_custom_call.1
= control target key start
LH: loop header
LB: loop body
LE: loop exit
PB: predicated region body
PF: predicated region fallthrough
CT: control target
= control target key end

     0   :  { %8 = vsyncpa [#allocation3], 0  ;;  %s4795_s0 = inlined_call_operand.hbm [shape: f32[128,768], index: 0, kind: input, shape index: {}]   ;;  %s4796_s1 = inlined_call_operand.hbm [shape: bf16[768,768], index: 1, kind: input, shape index: {}]   ;;  %s4797_s2 = inlined_call_operand.hbm [shape: f32[1,768], index: 2, kind: input, shape index: {}]   ;;  %s4798_s3 = inlined_call_operand.hbm [shape: f32[128,768], index: 3, kind: output, shape index: {}]  }
   0x1   :  { %9 = vsyncpa [#allocation6], 0 }
   0x2   :  { %10 = vsyncpa [#allocation4], 0  ;;  %s3935_s12 = smov [#allocation5]  }
   0x3   :  { %s28_s13 = sshll.u32 %s3935_s12, 4  ;;  %s29_s13 = int_to_ptr.vmem [resolvable:$true] %s28_s13 }
   0x4   :  { %s3857_s14 = scalar_lea.vmem %s29_s13, 36864  ;;  %p3862_p1 = scmp.lt.s32.totalorder %s29_s13, %s29_s13 }
   0x5   :  { %p3858_p0 = scmp.ne.s32.totalorder %s29_s13, %s3857_s14  ;;  %p3863_p2 = scmp.lt.s32.totalorder %s3857_s14, %s3857_s14 }
   0x7   :  { %p3864_p3 = por %p3863_p2, %p3862_p1 }
   0x9   :  { %p3865_p4 = pnand %p3864_p3, %p3858_p0 }
   0xb   :  { %3868 = shalt.err (!%p3865_p4)
}
   0xc   :  { %s3936_s15 = smov 384   ;;  %s3937_s16 = smov 24  }
   0xd   :  { %34 = dma.hbm_to_vmem [thread:$0]  %s4796_s1, 36864, %s29_s13, [#allocation6], %s3936_s15, %s3936_s15, %s3937_s16  }
   0xe   :  { %s3938_s19 = smov [#allocation2]  }
   0xf   :  { %s16_s20 = sshll.u32 %s3938_s19, 4  ;;  %s17_s20 = int_to_ptr.vmem [resolvable:$true] %s16_s20 }
  0x10   :  { %s3877_s21 = scalar_lea.vmem %s17_s20, 12288  ;;  %p3882_p6 = scmp.lt.s32.totalorder %s17_s20, %s17_s20 }
  0x11   :  { %p3878_p5 = scmp.ne.s32.totalorder %s17_s20, %s3877_s21  ;;  %p3883_p7 = scmp.lt.s32.totalorder %s3877_s21, %s3877_s21 }
  0x13   :  { %p3884_p8 = por %p3883_p7, %p3882_p6 }
  0x15   :  { %p3885_p9 = pnand %p3884_p8, %p3878_p5 }
  0x17   :  { %3888 = shalt.err (!%p3885_p9)
}
  0x18   :  { %s3939_s22 = smov 768   ;;  %s3940_s23 = smov 48  }
  0x19   :  { %22 = dma.hbm_to_vmem [thread:$0]  %s4795_s0, 12288, %s17_s20, [#allocation3], %s3939_s22, %s3939_s22, %s3940_s23  }
  0x1a   :  { %s3941_s1 = smov [#allocation7]  }
  0x1b   :  { %s41_s26 = sshll.u32 %s3941_s1, 4  ;;  %s42_s26 = int_to_ptr.vmem [resolvable:$true] %s41_s26 }
  0x1c   :  { %s3897_s27 = scalar_lea.vmem %s42_s26, 96  ;;  %p3902_p11 = scmp.lt.s32.totalorder %s42_s26, %s42_s26 }
  0x1d   :  { %p3898_p10 = scmp.ne.s32.totalorder %s42_s26, %s3897_s27  ;;  %p3903_p12 = scmp.lt.s32.totalorder %s3897_s27, %s3897_s27 }
  0x1f   :  { %p3904_p13 = por %p3903_p12, %p3902_p11 }
  0x21   :  { %p3905_p0 = pnand %p3904_p13, %p3898_p10 }
  0x23   :  { %3908 = shalt.err (!%p3905_p0)
}
  0x24   :  { %44 = dma.hbm_to_vmem [thread:$0]  %s4797_s2, 96, %s42_s26, [#allocation6]  }
  0x25   :  { %3929 = dma.done.wait [#allocation3], 12288  }
  0x26   :  { %3930 = vsyncadd [#allocation3], 4294955008 }
  0x27   :  { %3931 = dma.done.wait [#allocation6], 36960  }
  0x28   :  { %3932 = vsyncadd [#allocation6], 4294930336  ;;  %v3417_v0 = vld [vmem:[#allocation5 + $0x154] ss:$24 sps:$4 sm:$0xff]   ;;  %v3421_v2 = vld [vmem:[#allocation5 + $0x150] ss:$24 sps:$4 sm:$0xff]  }
  0x29   :  { %v3419_v1 = vld [vmem:[#allocation5 + $0x454] ss:$24 sps:$4 sm:$0xff]   ;;  %1958 = vmatprep.subr.bf16.mxu0 %v3417_v0  ;;  %v3422_v3 = vld [vmem:[#allocation5 + $0x450] ss:$24 sps:$4 sm:$0xff]   ;;  %v3423_v4 = vld [vmem:[#allocation5 + $0x124] ss:$24 sps:$4 sm:$0xff]  }
  0x2a   :  { %2071 = vmatprep.subr.bf16.mxu1 %v3419_v1  ;;  %1959 = vmatpush1.bf16.msra.mxu0 %v3421_v2  ;;  %v3425_v5 = vld [vmem:[#allocation5 + $0x424] ss:$24 sps:$4 sm:$0xff]   ;;  %v3427_v6 = vld [vmem:[#allocation5 + $0x120] ss:$24 sps:$4 sm:$0xff]   ;;  %v3429_v8 = vld [vmem:[#allocation5 + $0xf4] ss:$24 sps:$4 sm:$0xff]  }
  0x2b   :  { %2072 = vmatpush1.bf16.msra.mxu1 %v3422_v3  ;;  %1960 = vmatprep.subr.bf16.mxu0 %v3423_v4  ;;  %v3428_v7 = vld [vmem:[#allocation5 + $0x420] ss:$24 sps:$4 sm:$0xff]   ;;  %v3431_v9 = vld [vmem:[#allocation5 + $0x3f4] ss:$24 sps:$4 sm:$0xff]   ;;  %v3433_v10 = vld [vmem:[#allocation5 + $0xf0] ss:$24 sps:$4 sm:$0xff]  }
  0x2c   :  { %2073 = vmatprep.subr.bf16.mxu1 %v3425_v5  ;;  %v3434_v11 = vld [vmem:[#allocation5 + $0x3f0] ss:$24 sps:$4 sm:$0xff]   ;;  %v3435_v12 = vld [vmem:[#allocation5 + $0xc4] ss:$24 sps:$4 sm:$0xff]   ;;  %v3439_v14 = vld [vmem:[#allocation5 + $0xc0] ss:$24 sps:$4 sm:$0xff]  }
  0x2d   :  { %v3437_v13 = vld [vmem:[#allocation5 + $0x3c4] ss:$24 sps:$4 sm:$0xff]   ;;  %v3440_v15 = vld [vmem:[#allocation5 + $0x3c0] ss:$24 sps:$4 sm:$0xff]   ;;  %v3441_v16 = vld [vmem:[#allocation5 + $0x94] ss:$24 sps:$4 sm:$0xff]  }
  0x2e   :  { %1961 = vmatpush1.bf16.msra.mxu0 %v3427_v6  ;;  %v3443_v17 = vld [vmem:[#allocation5 + $0x394] ss:$24 sps:$4 sm:$0xff]   ;;  %v3445_v18 = vld [vmem:[#allocation5 + $0x90] ss:$24 sps:$4 sm:$0xff]   ;;  %v3447_v20 = vld [vmem:[#allocation5 + $0x64] ss:$24 sps:$4 sm:$0xff]  }
  0x2f   :  { %2074 = vmatpush1.bf16.msra.mxu1 %v3428_v7  ;;  %1962 = vmatprep.subr.bf16.mxu0 %v3429_v8  ;;  %v3446_v19 = vld [vmem:[#allocation5 + $0x390] ss:$24 sps:$4 sm:$0xff]   ;;  %v3449_v21 = vld [vmem:[#allocation5 + $0x364] ss:$24 sps:$4 sm:$0xff]   ;;  %v3451_v22 = vld [vmem:[#allocation5 + $0x60] ss:$24 sps:$4 sm:$0xff]  }
  0x30   :  { %2075 = vmatprep.subr.bf16.mxu1 %v3431_v9  ;;  %v3452_v23 = vld [vmem:[#allocation5 + $0x360] ss:$24 sps:$4 sm:$0xff]   ;;  %v3453_v24 = vld [vmem:[#allocation5 + $0x34] ss:$24 sps:$4 sm:$0xff]   ;;  %v3457_v26 = vld [vmem:[#allocation5 + $0x30] ss:$24 sps:$4 sm:$0xff]  }
  0x31   :  { %v3455_v25 = vld [vmem:[#allocation5 + $0x334] ss:$24 sps:$4 sm:$0xff]   ;;  %v3458_v27 = vld [vmem:[#allocation5 + $0x330] ss:$24 sps:$4 sm:$0xff]   ;;  %v3459_v28 = vld [vmem:[#allocation5 + $0x4] ss:$24 sps:$4 sm:$0xff]  }
  0x32   :  { %1963 = vmatpush1.bf16.msra.mxu0 %v3433_v10  ;;  %v3461_v29 = vld [vmem:[#allocation5 + $0x304] ss:$24 sps:$4 sm:$0xff]   ;;  %v3463_v30 = vld [vmem:[#allocation5] ss:$24 sps:$4 sm:$0xff]   ;;  %v3465_v32 = vld [vmem:[#allocation5 + $0x2d4] ss:$24 sps:$4 sm:$0xff]  }
  0x33   :  { %2076 = vmatpush1.bf16.msra.mxu1 %v3434_v11  ;;  %1964 = vmatprep.subr.bf16.mxu0 %v3435_v12  ;;  %v3464_v31 = vld [vmem:[#allocation5 + $0x300] ss:$24 sps:$4 sm:$0xff]   ;;  %v3467_v33 = vld [vmem:[#allocation5 + $0x5d4] ss:$24 sps:$4 sm:$0xff]   ;;  %v3469_v34 = vld [vmem:[#allocation5 + $0x2d0] ss:$24 sps:$4 sm:$0xff]  }
  0x34   :  { %2077 = vmatprep.subr.bf16.mxu1 %v3437_v13  ;;  %v3470_v35 = vld [vmem:[#allocation5 + $0x5d0] ss:$24 sps:$4 sm:$0xff]   ;;  %v3471_v36 = vld [vmem:[#allocation5 + $0x2a4] ss:$24 sps:$4 sm:$0xff]   ;;  %v3475_v38 = vld [vmem:[#allocation5 + $0x2a0] ss:$24 sps:$4 sm:$0xff]  }
  0x35   :  { %v3473_v37 = vld [vmem:[#allocation5 + $0x5a4] ss:$24 sps:$4 sm:$0xff]   ;;  %v3476_v39 = vld [vmem:[#allocation5 + $0x5a0] ss:$24 sps:$4 sm:$0xff]   ;;  %v3477_v40 = vld [vmem:[#allocation5 + $0x274] ss:$24 sps:$4 sm:$0xff]  }
  0x36   :  { %1965 = vmatpush1.bf16.msra.mxu0 %v3439_v14  ;;  %v3479_v41 = vld [vmem:[#allocation5 + $0x574] ss:$24 sps:$4 sm:$0xff]   ;;  %v3481_v42 = vld [vmem:[#allocation5 + $0x270] ss:$24 sps:$4 sm:$0xff]   ;;  %v3483_v44 = vld [vmem:[#allocation5 + $0x244] ss:$24 sps:$4 sm:$0xff]  }
  0x37   :  { %2078 = vmatpush1.bf16.msra.mxu1 %v3440_v15  ;;  %1966 = vmatprep.subr.bf16.mxu0 %v3441_v16  ;;  %v3482_v43 = vld [vmem:[#allocation5 + $0x570] ss:$24 sps:$4 sm:$0xff]   ;;  %v3485_v45 = vld [vmem:[#allocation5 + $0x544] ss:$24 sps:$4 sm:$0xff]   ;;  %v3487_v50 = vld [vmem:[#allocation5 + $0x240] ss:$24 sps:$4 sm:$0xff]  }
  0x38   :  { %2079 = vmatprep.subr.bf16.mxu1 %v3443_v17  ;;  %v55_v46 = vld [vmem:[#allocation2 + $0x8] sm:$0xff]  ;;  %v61_v47 = vld [vmem:[#allocation2 + $0x38] sm:$0xff]  ;;  %v54_v6 = vld [vmem:[#allocation2] sm:$0xff]  ;;  %s3942_s0 = smov [#allocation8]  }
  0x39   :  { %v57_v48 = vld [vmem:[#allocation2 + $0x18] sm:$0xff]  ;;  %v63_v49 = vld [vmem:[#allocation2 + $0x48] sm:$0xff]  ;;  %v3975_v53 = vpack.c.bf16 %v61_v47, %v55_v46  ;;  %v60_v7 = vld [vmem:[#allocation2 + $0x30] sm:$0xff]  ;;  %s3076_s2 = sshll.u32 %s3942_s0, 4  ;;  %s3077_s2 = int_to_ptr.vmem [resolvable:$true] %s3076_s2 }
  0x3a   :  { %1967 = vmatpush1.bf16.msra.mxu0 %v3445_v18  ;;  %v3488_v51 = vld [vmem:[#allocation5 + $0x540] ss:$24 sps:$4 sm:$0xff]   ;;  %v3489_v52 = vld [vmem:[#allocation5 + $0x214] ss:$24 sps:$4 sm:$0xff]   ;;  %v3977_v54 = vpack.c.bf16 %v63_v49, %v57_v48  ;;  %v3493_v56 = vld [vmem:[#allocation5 + $0x210] ss:$24 sps:$4 sm:$0xff]   ;;  %v3981_v16 = vpack.c.bf16 %v60_v7, %v54_v6  ;;  %p3914_p2 = scmp.lt.s32.totalorder %s3077_s2, %s3077_s2 }
  0x3b   :  { %2080 = vmatpush1.bf16.msra.mxu1 %v3446_v19  ;;  %1968 = vmatprep.subr.bf16.mxu0 %v3447_v20  ;;  %v3491_v55 = vld [vmem:[#allocation5 + $0x514] ss:$24 sps:$4 sm:$0xff]   ;;  %v3494_v57 = vld [vmem:[#allocation5 + $0x510] ss:$24 sps:$4 sm:$0xff]   ;;  %v3495_v58 = vld [vmem:[#allocation5 + $0x1e4] ss:$24 sps:$4 sm:$0xff]  }
  0x3c   :  { %2081 = vmatprep.subr.bf16.mxu1 %v3449_v21  ;;  %1990 = vmatprep.mubr.bf16.mxu0 %v3975_v53  ;;  %v3497_v59 = vld [vmem:[#allocation5 + $0x4e4] ss:$24 sps:$4 sm:$0xff]   ;;  %v3499_v60 = vld [vmem:[#allocation5 + $0x1e0] ss:$24 sps:$4 sm:$0xff]   ;;  %v3501_v62 = vld [vmem:[#allocation5 + $0x1b4] ss:$24 sps:$4 sm:$0xff]  }
  0x3d   :  { %2103 = vmatprep.mubr.bf16.mxu1 %v3977_v54  ;;  %v3500_v61 = vld [vmem:[#allocation5 + $0x4e0] ss:$24 sps:$4 sm:$0xff]   ;;  %v3503_v63 = vld [vmem:[#allocation5 + $0x4b4] ss:$24 sps:$4 sm:$0xff]   ;;  %v3505_v0 = vld [vmem:[#allocation5 + $0x1b0] ss:$24 sps:$4 sm:$0xff]  }
  0x3e   :  { %1969 = vmatpush1.bf16.msra.mxu0 %v3451_v22  ;;  %v3506_v1 = vld [vmem:[#allocation5 + $0x4b0] ss:$24 sps:$4 sm:$0xff]   ;;  %v3507_v2 = vld [vmem:[#allocation5 + $0x184] ss:$24 sps:$4 sm:$0xff]   ;;  %v3511_v4 = vld [vmem:[#allocation5 + $0x180] ss:$24 sps:$4 sm:$0xff]  }
  0x3f   :  { %2082 = vmatpush1.bf16.msra.mxu1 %v3452_v23  ;;  %1970 = vmatprep.subr.bf16.mxu0 %v3453_v24  ;;  %v3509_v3 = vld [vmem:[#allocation5 + $0x484] ss:$24 sps:$4 sm:$0xff]   ;;  %v3512_v5 = vld [vmem:[#allocation5 + $0x480] ss:$24 sps:$4 sm:$0xff]   ;;  %v56_v8 = vld [vmem:[#allocation2 + $0x10] sm:$0xff]  ;;  %s3909_s30 = scalar_lea.vmem %s3077_s2, 12288 }
  0x40   :  { %2083 = vmatprep.subr.bf16.mxu1 %v3455_v25  ;;  %v62_v9 = vld [vmem:[#allocation2 + $0x40] sm:$0xff]  ;;  %v3515_v10 = vld [vmem:[#allocation5 + $0x754] ss:$24 sps:$4 sm:$0xff]   ;;  %v3513_v12 = vld [vmem:[#allocation5 + $0x750] ss:$24 sps:$4 sm:$0xff]   ;;  %p3910_p1 = scmp.ne.s32.totalorder %s3077_s2, %s3909_s30  ;;  %p3915_p3 = scmp.lt.s32.totalorder %s3909_s30, %s3909_s30 }
  0x41   :  { %v3518_v11 = vld [vmem:[#allocation5 + $0x15c] ss:$24 sps:$4 sm:$0xff]   ;;  %v3516_v13 = vld [vmem:[#allocation5 + $0x158] ss:$24 sps:$4 sm:$0xff]   ;;  %v67_v14 = vld [vmem:[#allocation2 + $0x68] sm:$0xff]  ;;  %v3983_v17 = vpack.c.bf16 %v62_v9, %v56_v8 }
  0x42   :  { %1971 = vmatpush1.bf16.msra.mxu0 %v3457_v26  ;;  %v73_v15 = vld [vmem:[#allocation2 + $0x98] sm:$0xff]  ;;  %v75_v19 = vld [vmem:[#allocation2 + $0xa8] sm:$0xff]  ;;  %v66_v26 = vld [vmem:[#allocation2 + $0x60] sm:$0xff]  ;;  %p3916_p4 = por %p3915_p3, %p3914_p2 }
  0x43   :  { %2084 = vmatpush1.bf16.msra.mxu1 %v3458_v27  ;;  %1972 = vmatprep.subr.bf16.mxu0 %v3459_v28  ;;  %v69_v18 = vld [vmem:[#allocation2 + $0x78] sm:$0xff]  ;;  %v3524_v21 = vld [vmem:[#allocation5 + $0x12c] ss:$24 sps:$4 sm:$0xff]   ;;  %v3985_v23 = vpack.c.bf16 %v73_v15, %v67_v14  ;;  %v3522_v25 = vld [vmem:[#allocation5 + $0x128] ss:$24 sps:$4 sm:$0xff]  }
  0x44   :  { %2085 = vmatprep.subr.bf16.mxu1 %v3461_v29  ;;  %v3521_v20 = vld [vmem:[#allocation5 + $0x724] ss:$24 sps:$4 sm:$0xff]   ;;  %v3519_v22 = vld [vmem:[#allocation5 + $0x720] ss:$24 sps:$4 sm:$0xff]   ;;  %v3987_v24 = vpack.c.bf16 %v75_v19, %v69_v18  ;;  %v72_v27 = vld [vmem:[#allocation2 + $0x90] sm:$0xff]  ;;  %p3917_p5 = pnand %p3916_p4, %p3910_p1 }
  0x45   :  { %v68_v28 = vld [vmem:[#allocation2 + $0x70] sm:$0xff]  ;;  %v74_v29 = vld [vmem:[#allocation2 + $0xa0] sm:$0xff]  ;;  %v105_v18 = vld [vmem:[#allocation2 + $0x198] sm:$0xff] }
  0x46   :  { %1973 = vmatpush1.bf16.msra.mxu0 %v3463_v30  ;;  %v3527_v30 = vld [vmem:[#allocation5 + $0x6f4] ss:$24 sps:$4 sm:$0xff]   ;;  %v78_v46 = vld [vmem:[#allocation2 + $0xc0] sm:$0xff] }
  0x47   :  { %2086 = vmatpush1.bf16.msra.mxu1 %v3464_v31  ;;  %1974 = vmatprep.subr.bf16.mxu0 %v3465_v32  ;;  %v3530_v31 = vld [vmem:[#allocation5 + $0xfc] ss:$24 sps:$4 sm:$0xff]   ;;  %v3525_v32 = vld [vmem:[#allocation5 + $0x6f0] ss:$24 sps:$4 sm:$0xff]   ;;  %v86_v49 = vld [vmem:[#allocation2 + $0x100] sm:$0xff] }
  0x48   :  { %2087 = vmatprep.subr.bf16.mxu1 %v3467_v33  ;;  %v3528_v33 = vld [vmem:[#allocation5 + $0xf8] ss:$24 sps:$4 sm:$0xff]   ;;  %v98_v7 = vld [vmem:[#allocation2 + $0x160] sm:$0xff]  ;;  %v3551_v8 = vld [vmem:[#allocation5 + $0x634] ss:$24 sps:$4 sm:$0xff]  }
  0x49   :  { %v84_v47 = vld [vmem:[#allocation2 + $0xf0] sm:$0xff]  ;;  %v111_v19 = vld [vmem:[#allocation2 + $0x1c8] sm:$0xff] }
  0x4a   :  { %1975 = vmatpush2.bf16.msra.mxu0 %v3469_v34  ;;  %v79_v34 = vld [vmem:[#allocation2 + $0xc8] sm:$0xff]  ;;  %v80_v48 = vld [vmem:[#allocation2 + $0xd0] sm:$0xff] }
  0x4b   :  { %2088 = vmatpush2.bf16.msra.mxu1 %v3470_v35  ;;  %1976 = vmatprep.subr.bf16.mxu0 %v3471_v36  ;;  %v85_v35 = vld [vmem:[#allocation2 + $0xf8] sm:$0xff]  ;;  %v3993_v36 = vpack.c.bf16 %v72_v27, %v66_v26  ;;  %v92_v6 = vld [vmem:[#allocation2 + $0x130] sm:$0xff]  ;;  %v4023_v26 = vpack.c.bf16 %v111_v19, %v105_v18  ;;  %v3558_v27 = vld [vmem:[#allocation5 + $0x8] ss:$24 sps:$4 sm:$0xff]  }
  0x4c   :  { %2089 = vmatprep.subr.bf16.mxu1 %v3473_v37  ;;  %v3995_v37 = vpack.c.bf16 %v74_v29, %v68_v28  ;;  %v3554_v9 = vld [vmem:[#allocation5 + $0x3c] ss:$24 sps:$4 sm:$0xff]   ;;  %v4019_v15 = vpack.c.bf16 %v98_v7, %v92_v6  ;;  %v102_v28 = vld [vmem:[#allocation2 + $0x180] sm:$0xff]  ;;  %v135_v7 = vld [vmem:[#allocation2 + $0x288] sm:$0xff] }
  0x4d   :  { %v108_v29 = vld [vmem:[#allocation2 + $0x1b0] sm:$0xff]  ;;  %v129_v6 = vld [vmem:[#allocation2 + $0x258] sm:$0xff]  ;;  %v126_v18 = vld [vmem:[#allocation2 + $0x240] sm:$0xff] }
  0x4e   :  { %1977 = vmatpush2.bf16.msra.mxu0 %v3475_v38  ;;  %v81_v38 = vld [vmem:[#allocation2 + $0xd8] sm:$0xff]  ;;  %v132_v19 = vld [vmem:[#allocation2 + $0x270] sm:$0xff] }
  0x4f   :  { %2090 = vmatpush2.bf16.msra.mxu1 %v3476_v39  ;;  %1978 = vmatprep.subr.bf16.mxu0 %v3477_v40  ;;  %v87_v39 = vld [vmem:[#allocation2 + $0x108] sm:$0xff]  ;;  %v3533_v40 = vld [vmem:[#allocation5 + $0x6c4] ss:$24 sps:$4 sm:$0xff]  }
  0x50   :  { %2091 = vmatprep.subr.bf16.mxu1 %v3479_v41  ;;  %v3536_v41 = vld [vmem:[#allocation5 + $0xcc] ss:$24 sps:$4 sm:$0xff]  }
  0x52   :  { %1979 = vmatpush2.bf16.msra.mxu0 %v3481_v42  ;;  %v3531_v42 = vld [vmem:[#allocation5 + $0x6c0] ss:$24 sps:$4 sm:$0xff]  }
  0x53   :  { %2092 = vmatpush2.bf16.msra.mxu1 %v3482_v43  ;;  %1980 = vmatprep.subr.bf16.mxu0 %v3483_v44  ;;  %v3997_v43 = vpack.c.bf16 %v85_v35, %v79_v34  ;;  %v3999_v44 = vpack.c.bf16 %v87_v39, %v81_v38  ;;  %v3561_v34 = vld [vmem:[#allocation5 + $0x8d0] ss:$24 sps:$4 sm:$0xff]   ;;  %v121_v39 = vld [vmem:[#allocation2 + $0x218] sm:$0xff] }
  0x54   :  { %2093 = vmatprep.subr.bf16.mxu1 %v3485_v45  ;;  %v3534_v45 = vld [vmem:[#allocation5 + $0xc8] ss:$24 sps:$4 sm:$0xff]   ;;  %v3564_v35 = vld [vmem:[#allocation5 + $0x2d8] ss:$24 sps:$4 sm:$0xff]  }
  0x55   :  { %v115_v38 = vld [vmem:[#allocation2 + $0x1e8] sm:$0xff] }
  0x56   :  { %1981 = vmatpush2.bf16.msra.mxu0 %v3487_v50  ;;  %v3539_v50 = vld [vmem:[#allocation5 + $0x694] ss:$24 sps:$4 sm:$0xff]  }
  0x57   :  { %2094 = vmatpush2.bf16.msra.mxu1 %v3488_v51  ;;  %1982 = vmatprep.subr.bf16.mxu0 %v3489_v52  ;;  %v3542_v51 = vld [vmem:[#allocation5 + $0x9c] ss:$24 sps:$4 sm:$0xff]   ;;  %v3537_v52 = vld [vmem:[#allocation5 + $0x690] ss:$24 sps:$4 sm:$0xff]  }
  0x58   :  { %2095 = vmatprep.subr.bf16.mxu1 %v3491_v55  ;;  %v3540_v55 = vld [vmem:[#allocation5 + $0x98] ss:$24 sps:$4 sm:$0xff]  }
  0x5a   :  { %1983 = vmatpush2.bf16.msra.mxu0 %v3493_v56  ;;  %v91_v56 = vld [vmem:[#allocation2 + $0x128] sm:$0xff] }
  0x5b   :  { %2096 = vmatpush2.bf16.msra.mxu1 %v3494_v57  ;;  %1984 = vmatprep.subr.bf16.mxu0 %v3495_v58  ;;  %v97_v57 = vld [vmem:[#allocation2 + $0x158] sm:$0xff]  ;;  %v4005_v58 = vpack.c.bf16 %v84_v47, %v78_v46  ;;  %v3572_v47 = vld [vmem:[#allocation5 + $0x2ac] ss:$24 sps:$4 sm:$0xff]  }
  0x5c   :  { %2097 = vmatprep.subr.bf16.mxu1 %v3497_v59  ;;  %v4007_v59 = vpack.c.bf16 %v86_v49, %v80_v48  ;;  %v3569_v46 = vld [vmem:[#allocation5 + $0x8a4] ss:$24 sps:$4 sm:$0xff]   ;;  %v3567_v48 = vld [vmem:[#allocation5 + $0x8a0] ss:$24 sps:$4 sm:$0xff]   ;;  %v4033_v49 = vpack.c.bf16 %v121_v39, %v115_v38 }
  0x5d   :  { %v3593_v38 = vld [vmem:[#allocation5 + $0x7e4] ss:$24 sps:$4 sm:$0xff]  }
  0x5e   :  { %1985 = vmatpush2.bf16.msra.mxu0 %v3499_v60  ;;  %v93_v60 = vld [vmem:[#allocation2 + $0x138] sm:$0xff]  ;;  %v3596_v39 = vld [vmem:[#allocation5 + $0x1ec] ss:$24 sps:$4 sm:$0xff]  }
  0x5f   :  { %2098 = vmatpush2.bf16.msra.mxu1 %v3500_v61  ;;  %1986 = vmatprep.subr.bf16.mxu0 %v3501_v62  ;;  %v99_v61 = vld [vmem:[#allocation2 + $0x168] sm:$0xff]  ;;  %v3545_v62 = vld [vmem:[#allocation5 + $0x664] ss:$24 sps:$4 sm:$0xff]  }
  0x60   :  { %2099 = vmatprep.subr.bf16.mxu1 %v3503_v63  ;;  %v3548_v63 = vld [vmem:[#allocation5 + $0x6c] ss:$24 sps:$4 sm:$0xff]  }
  0x62   :  { %1987 = vmatpush2.bf16.msra.mxu0 %v3505_v0  ;;  %v3543_v0 = vld [vmem:[#allocation5 + $0x660] ss:$24 sps:$4 sm:$0xff]  }
  0x63   :  { %2100 = vmatpush2.bf16.msra.mxu1 %v3506_v1  ;;  %1988 = vmatprep.subr.bf16.mxu0 %v3507_v2  ;;  %v4009_v1 = vpack.c.bf16 %v97_v57, %v91_v56  ;;  %v4011_v2 = vpack.c.bf16 %v99_v61, %v93_v60  ;;  %v116_v56 = vld [vmem:[#allocation2 + $0x1f0] sm:$0xff]  ;;  %v122_v57 = vld [vmem:[#allocation2 + $0x220] sm:$0xff] }
  0x64   :  { %2101 = vmatprep.subr.bf16.mxu1 %v3509_v3  ;;  %v3546_v3 = vld [vmem:[#allocation5 + $0x68] ss:$24 sps:$4 sm:$0xff]   ;;  %v3575_v60 = vld [vmem:[#allocation5 + $0x874] ss:$24 sps:$4 sm:$0xff]  }
  0x65   :  { %v3578_v61 = vld [vmem:[#allocation5 + $0x27c] ss:$24 sps:$4 sm:$0xff]  }
  0x66   :  { %1989 = vmatpush2.bf16.msra.mxu0 %v3511_v4  ;;  %v90_v4 = vld [vmem:[#allocation2 + $0x120] sm:$0xff] }
  0x67   :  { %2102 = vmatpush2.bf16.msra.mxu1 %v3512_v5  ;;  %2184 = vmatprep.subr.bf16.mxu0 %v3515_v10  ;;  %v96_v5 = vld [vmem:[#allocation2 + $0x150] sm:$0xff] }
  0x68   :  { %2297 = vmatprep.subr.bf16.mxu1 %v3518_v11  ;;  %v3549_v10 = vld [vmem:[#allocation5 + $0x630] ss:$24 sps:$4 sm:$0xff]   ;;  %v4017_v14 = vpack.c.bf16 %v96_v5, %v90_v4  ;;  %v4043_v5 = vpack.c.bf16 %v122_v57, %v116_v56  ;;  %v3599_v56 = vld [vmem:[#allocation5 + $0x7b4] ss:$24 sps:$4 sm:$0xff]  }
  0x69   :  { %1991 = vmatmul.mubr.bf16.vlgmr.msra.gmra.mxu0 %v3981_v16  ;;  %v3552_v11 = vld [vmem:[#allocation5 + $0x38] ss:$24 sps:$4 sm:$0xff]   ;;  %v3602_v57 = vld [vmem:[#allocation5 + $0x1bc] ss:$24 sps:$4 sm:$0xff]  }
  0x6a   :  { %2104 = vmatmul.mubr.bf16.vlgmr.msra.gmra.mxu1 %v3983_v17  ;;  %2185 = vmatpush1.bf16.msra.mxu0 %v3513_v12  ;;  %v103_v12 = vld [vmem:[#allocation2 + $0x188] sm:$0xff] }
  0x6b   :  { %2298 = vmatpush1.bf16.msra.mxu1 %v3516_v13  ;;  %2186 = vmatprep.subr.bf16.mxu0 %v3521_v20  ;;  %v109_v13 = vld [vmem:[#allocation2 + $0x1b8] sm:$0xff] }
  0x6c   :  { %2299 = vmatprep.subr.bf16.mxu1 %v3524_v21  ;;  %2000 = vmatprep.mubr.bf16.mxu0 %v3985_v23  ;;  %v3557_v20 = vld [vmem:[#allocation5 + $0x604] ss:$24 sps:$4 sm:$0xff]  }
  0x6d   :  { %2113 = vmatprep.mubr.bf16.mxu1 %v3987_v24  ;;  %v3560_v21 = vld [vmem:[#allocation5 + $0xc] ss:$24 sps:$4 sm:$0xff]  }
  0x6e   :  { %2187 = vmatpush1.bf16.msra.mxu0 %v3519_v22  ;;  %v3555_v22 = vld [vmem:[#allocation5 + $0x600] ss:$24 sps:$4 sm:$0xff]  }
  0x6f   :  { %2300 = vmatpush1.bf16.msra.mxu1 %v3522_v25  ;;  %2188 = vmatprep.subr.bf16.mxu0 %v3527_v30  ;;  %v4021_v25 = vpack.c.bf16 %v109_v13, %v103_v12  ;;  %v104_v30 = vld [vmem:[#allocation2 + $0x190] sm:$0xff]  ;;  %v4047_v13 = vpack.c.bf16 %v135_v7, %v129_v6  ;;  %v3605_v6 = vld [vmem:[#allocation5 + $0x784] ss:$24 sps:$4 sm:$0xff]  }
  0x70   :  { %2301 = vmatprep.subr.bf16.mxu1 %v3530_v31  ;;  %v110_v31 = vld [vmem:[#allocation2 + $0x1c0] sm:$0xff] }
  0x71   :  { %2001 = vmatmul.mubr.bf16.gmra.mxu0 %v3993_v36  ;;  %v3608_v7 = vld [vmem:[#allocation5 + $0x18c] ss:$24 sps:$4 sm:$0xff]  }
  0x72   :  { %2114 = vmatmul.mubr.bf16.gmra.mxu1 %v3995_v37  ;;  %2189 = vmatpush1.bf16.msra.mxu0 %v3525_v32  ;;  %v3563_v32 = vld [vmem:[#allocation5 + $0x8d4] ss:$24 sps:$4 sm:$0xff]  }
  0x73   :  { %2302 = vmatpush1.bf16.msra.mxu1 %v3528_v33  ;;  %2190 = vmatprep.subr.bf16.mxu0 %v3533_v40  ;;  %v3566_v33 = vld [vmem:[#allocation5 + $0x2dc] ss:$24 sps:$4 sm:$0xff]   ;;  %v4029_v40 = vpack.c.bf16 %v108_v29, %v102_v28  ;;  %v3585_v28 = vld [vmem:[#allocation5 + $0x810] ss:$24 sps:$4 sm:$0xff]  }
  0x74   :  { %2303 = vmatprep.subr.bf16.mxu1 %v3536_v41  ;;  %2010 = vmatprep.mubr.bf16.mxu0 %v3997_v43  ;;  %v4031_v41 = vpack.c.bf16 %v110_v31, %v104_v30  ;;  %v139_v29 = vld [vmem:[#allocation2 + $0x2a8] sm:$0xff]  ;;  %v145_v30 = vld [vmem:[#allocation2 + $0x2d8] sm:$0xff]  ;;  %v4053_v31 = vpack.c.bf16 %v132_v19, %v126_v18  ;;  %v64_v18 = vld [vmem:[#allocation2 + $0x50] sm:$0xff] }
  0x75   :  { %2123 = vmatprep.mubr.bf16.mxu1 %v3999_v44  ;;  %v3611_v19 = vld [vmem:[#allocation5 + $0x45c] ss:$24 sps:$4 sm:$0xff]  }
  0x76   :  { %2191 = vmatpush1.bf16.msra.mxu0 %v3531_v42  ;;  %v117_v42 = vld [vmem:[#allocation2 + $0x1f8] sm:$0xff] }
  0x77   :  { %2304 = vmatpush1.bf16.msra.mxu1 %v3534_v45  ;;  %2192 = vmatprep.subr.bf16.mxu0 %v3539_v50  ;;  %v123_v45 = vld [vmem:[#allocation2 + $0x228] sm:$0xff] }
  0x78   :  { %2305 = vmatprep.subr.bf16.mxu1 %v3542_v51  ;;  %v4035_v50 = vpack.c.bf16 %v123_v45, %v117_v42  ;;  %v3570_v51 = vld [vmem:[#allocation5 + $0x2a8] ss:$24 sps:$4 sm:$0xff]  }
  0x79   :  { %2011 = vmatmul.mubr.bf16.gmra.mxu0 %v4005_v58  ;;  %v3591_v42 = vld [vmem:[#allocation5 + $0x7e0] ss:$24 sps:$4 sm:$0xff]  }
  0x7a   :  { %2124 = vmatmul.mubr.bf16.gmra.mxu1 %v4007_v59  ;;  %2193 = vmatpush1.bf16.msra.mxu0 %v3537_v52  ;;  %v114_v52 = vld [vmem:[#allocation2 + $0x1e0] sm:$0xff] }
  0x7b   :  { %2306 = vmatpush1.bf16.msra.mxu1 %v3540_v55  ;;  %2194 = vmatprep.subr.bf16.mxu0 %v3545_v62  ;;  %v120_v55 = vld [vmem:[#allocation2 + $0x210] sm:$0xff]  ;;  %v3594_v45 = vld [vmem:[#allocation5 + $0x1e8] ss:$24 sps:$4 sm:$0xff]  }
  0x7c   :  { %2307 = vmatprep.subr.bf16.mxu1 %v3548_v63  ;;  %2020 = vmatprep.mubr.bf16.mxu0 %v4009_v1  ;;  %v3573_v62 = vld [vmem:[#allocation5 + $0x870] ss:$24 sps:$4 sm:$0xff]   ;;  %v4041_v4 = vpack.c.bf16 %v120_v55, %v114_v52  ;;  %v146_v55 = vld [vmem:[#allocation2 + $0x2e0] sm:$0xff] }
  0x7d   :  { %2133 = vmatprep.mubr.bf16.mxu1 %v4011_v2  ;;  %v3576_v63 = vld [vmem:[#allocation5 + $0x278] ss:$24 sps:$4 sm:$0xff]  }
  0x7e   :  { %2195 = vmatpush1.bf16.msra.mxu0 %v3543_v0  ;;  %v127_v0 = vld [vmem:[#allocation2 + $0x248] sm:$0xff]  ;;  %v140_v52 = vld [vmem:[#allocation2 + $0x2b0] sm:$0xff] }
  0x7f   :  { %2308 = vmatpush1.bf16.msra.mxu1 %v3546_v3  ;;  %2196 = vmatprep.subr.bf16.mxu0 %v3551_v8  ;;  %v133_v3 = vld [vmem:[#allocation2 + $0x278] sm:$0xff] }
  0x80   :  { %2309 = vmatprep.subr.bf16.mxu1 %v3554_v9  ;;  %v3581_v8 = vld [vmem:[#allocation5 + $0x844] ss:$24 sps:$4 sm:$0xff]   ;;  %v4045_v12 = vpack.c.bf16 %v133_v3, %v127_v0  ;;  %v3597_v0 = vld [vmem:[#allocation5 + $0x7b0] ss:$24 sps:$4 sm:$0xff]  }
  0x81   :  { %2021 = vmatmul.mubr.bf16.gmra.mxu0 %v4017_v14  ;;  %v3584_v9 = vld [vmem:[#allocation5 + $0x24c] ss:$24 sps:$4 sm:$0xff]   ;;  %v3600_v3 = vld [vmem:[#allocation5 + $0x1b8] ss:$24 sps:$4 sm:$0xff]  }
  0x82   :  { %2134 = vmatmul.mubr.bf16.gmra.mxu1 %v4019_v15  ;;  %2197 = vmatpush1.bf16.msra.mxu0 %v3549_v10  ;;  %v3579_v10 = vld [vmem:[#allocation5 + $0x840] ss:$24 sps:$4 sm:$0xff]  }
  0x83   :  { %2310 = vmatpush1.bf16.msra.mxu1 %v3552_v11  ;;  %2198 = vmatprep.subr.bf16.mxu0 %v3557_v20  ;;  %v3582_v11 = vld [vmem:[#allocation5 + $0x248] ss:$24 sps:$4 sm:$0xff]   ;;  %v128_v20 = vld [vmem:[#allocation2 + $0x250] sm:$0xff] }
  0x84   :  { %2311 = vmatprep.subr.bf16.mxu1 %v3560_v21  ;;  %2030 = vmatprep.mubr.bf16.mxu0 %v4021_v25  ;;  %v134_v21 = vld [vmem:[#allocation2 + $0x280] sm:$0xff] }
  0x85   :  { %2143 = vmatprep.mubr.bf16.mxu1 %v4023_v26 }
  0x86   :  { %2199 = vmatpush1.bf16.msra.mxu0 %v3555_v22  ;;  %v3587_v22 = vld [vmem:[#allocation5 + $0x814] ss:$24 sps:$4 sm:$0xff]  }
  0x87   :  { %2312 = vmatpush1.bf16.msra.mxu1 %v3558_v27  ;;  %2200 = vmatprep.subr.bf16.mxu0 %v3563_v32  ;;  %v3590_v27 = vld [vmem:[#allocation5 + $0x21c] ss:$24 sps:$4 sm:$0xff]   ;;  %v4055_v32 = vpack.c.bf16 %v134_v21, %v128_v20  ;;  %v3609_v21 = vld [vmem:[#allocation5 + $0x458] ss:$24 sps:$4 sm:$0xff]  }
  0x88   :  { %2313 = vmatprep.subr.bf16.mxu1 %v3566_v33  ;;  %v141_v33 = vld [vmem:[#allocation2 + $0x2b8] sm:$0xff] }
  0x89   :  { %2031 = vmatmul.mubr.bf16.gmra.mxu0 %v4029_v40  ;;  %v3614_v20 = vld [vmem:[#allocation5 + $0x75c] ss:$24 sps:$4 sm:$0xff]  }
  0x8a   :  { %2144 = vmatmul.mubr.bf16.gmra.mxu1 %v4031_v41  ;;  %2201 = vmatpush2.bf16.msra.mxu0 %v3561_v34  ;;  %v147_v34 = vld [vmem:[#allocation2 + $0x2e8] sm:$0xff] }
  0x8b   :  { %2314 = vmatpush2.bf16.msra.mxu1 %v3564_v35  ;;  %2202 = vmatprep.subr.bf16.mxu0 %v3569_v46  ;;  %v3588_v35 = vld [vmem:[#allocation5 + $0x218] ss:$24 sps:$4 sm:$0xff]   ;;  %v4057_v46 = vpack.c.bf16 %v145_v30, %v139_v29  ;;  %v3617_v30 = vld [vmem:[#allocation5 + $0x42c] ss:$24 sps:$4 sm:$0xff]  }
  0x8c   :  { %2315 = vmatprep.subr.bf16.mxu1 %v3572_v47  ;;  %2040 = vmatprep.mubr.bf16.mxu0 %v4033_v49  ;;  %v4059_v47 = vpack.c.bf16 %v147_v34, %v141_v33  ;;  %v77_v29 = vld [vmem:[#allocation2 + $0xb8] sm:$0xff]  ;;  %v3620_v33 = vld [vmem:[#allocation5 + $0x72c] ss:$24 sps:$4 sm:$0xff]   ;;  %v3615_v34 = vld [vmem:[#allocation5 + $0x428] ss:$24 sps:$4 sm:$0xff]  }
  0x8d   :  { %2153 = vmatprep.mubr.bf16.mxu1 %v4035_v50 }
  0x8e   :  { %2203 = vmatpush2.bf16.msra.mxu0 %v3567_v48  ;;  %v138_v48 = vld [vmem:[#allocation2 + $0x2a0] sm:$0xff] }
  0x8f   :  { %2316 = vmatpush2.bf16.msra.mxu1 %v3570_v51  ;;  %2204 = vmatprep.subr.bf16.mxu0 %v3575_v60  ;;  %v144_v51 = vld [vmem:[#allocation2 + $0x2d0] sm:$0xff] }
  0x90   :  { %2317 = vmatprep.subr.bf16.mxu1 %v3578_v61  ;;  %v4065_v60 = vpack.c.bf16 %v144_v51, %v138_v48  ;;  %v4067_v61 = vpack.c.bf16 %v146_v55, %v140_v52  ;;  %v3626_v48 = vld [vmem:[#allocation5 + $0x6fc] ss:$24 sps:$4 sm:$0xff]   ;;  %v3621_v51 = vld [vmem:[#allocation5 + $0x3f8] ss:$24 sps:$4 sm:$0xff]  }
  0x91   :  { %2041 = vmatmul.mubr.bf16.gmra.mxu0 %v4041_v4  ;;  %v3624_v52 = vld [vmem:[#allocation5 + $0x6f8] ss:$24 sps:$4 sm:$0xff]  }
  0x92   :  { %2154 = vmatmul.mubr.bf16.gmra.mxu1 %v4043_v5  ;;  %2205 = vmatpush2.bf16.msra.mxu0 %v3573_v62  ;;  %v59_v62 = vld [vmem:[#allocation2 + $0x28] sm:$0xff] }
  0x93   :  { %2318 = vmatpush2.bf16.msra.mxu1 %v3576_v63  ;;  %2206 = vmatprep.subr.bf16.mxu0 %v3581_v8  ;;  %v65_v63 = vld [vmem:[#allocation2 + $0x58] sm:$0xff] }
  0x94   :  { %2319 = vmatprep.subr.bf16.mxu1 %v3584_v9  ;;  %2050 = vmatprep.mubr.bf16.mxu0 %v4045_v12  ;;  %v3603_v8 = vld [vmem:[#allocation5 + $0x780] ss:$24 sps:$4 sm:$0xff]  }
  0x95   :  { %2163 = vmatprep.mubr.bf16.mxu1 %v4047_v13  ;;  %v3606_v9 = vld [vmem:[#allocation5 + $0x188] ss:$24 sps:$4 sm:$0xff]  }
  0x96   :  { %2207 = vmatpush2.bf16.msra.mxu0 %v3579_v10  ;;  %v4069_v10 = vpack.c.bf16 %v65_v63, %v59_v62  ;;  %v3629_v62 = vld [vmem:[#allocation5 + $0x3cc] ss:$24 sps:$4 sm:$0xff]  }
  0x97   :  { %2320 = vmatpush2.bf16.msra.mxu1 %v3582_v11  ;;  %2208 = vmatprep.subr.bf16.mxu0 %v3587_v22  ;;  %v58_v11 = vld [vmem:[#allocation2 + $0x20] sm:$0xff] }
  0x98   :  { %2321 = vmatprep.subr.bf16.mxu1 %v3590_v27  ;;  %v4075_v22 = vpack.c.bf16 %v64_v18, %v58_v11  ;;  %v3612_v27 = vld [vmem:[#allocation5 + $0x758] ss:$24 sps:$4 sm:$0xff]   ;;  %v3632_v63 = vld [vmem:[#allocation5 + $0x6cc] ss:$24 sps:$4 sm:$0xff]   ;;  %v3638_v11 = vld [vmem:[#allocation5 + $0x69c] ss:$24 sps:$4 sm:$0xff]  }
  0x99   :  { %2051 = vmatmul.mubr.bf16.gmra.mxu0 %v4053_v31  ;;  %v3633_v18 = vld [vmem:[#allocation5 + $0x398] ss:$24 sps:$4 sm:$0xff]  }
  0x9a   :  { %2164 = vmatmul.mubr.bf16.gmra.mxu1 %v4055_v32  ;;  %2209 = vmatpush2.bf16.msra.mxu0 %v3585_v28  ;;  %v71_v28 = vld [vmem:[#allocation2 + $0x88] sm:$0xff] }
  0x9b   :  { %2322 = vmatpush2.bf16.msra.mxu1 %v3588_v35  ;;  %2210 = vmatprep.subr.bf16.mxu0 %v3593_v38  ;;  %v4077_v35 = vpack.c.bf16 %v77_v29, %v71_v28  ;;  %v3618_v38 = vld [vmem:[#allocation5 + $0x728] ss:$24 sps:$4 sm:$0xff]   ;;  %v3641_v28 = vld [vmem:[#allocation5 + $0x36c] ss:$24 sps:$4 sm:$0xff]  }
  0x9c   :  { %2323 = vmatprep.subr.bf16.mxu1 %v3596_v39  ;;  %2060 = vmatprep.mubr.bf16.mxu0 %v4057_v46  ;;  %v70_v39 = vld [vmem:[#allocation2 + $0x80] sm:$0xff] }
  0x9d   :  { %2173 = vmatprep.mubr.bf16.mxu1 %v4059_v47  ;;  %v3644_v29 = vld [vmem:[#allocation5 + $0x66c] ss:$24 sps:$4 sm:$0xff]  }
  0x9e   :  { %2211 = vmatpush2.bf16.msra.mxu0 %v3591_v42  ;;  %v76_v42 = vld [vmem:[#allocation2 + $0xb0] sm:$0xff] }
  0x9f   :  { %2324 = vmatpush2.bf16.msra.mxu1 %v3594_v45  ;;  %2212 = vmatprep.subr.bf16.mxu0 %v3599_v56  ;;  %v3623_v45 = vld [vmem:[#allocation5 + $0x3fc] ss:$24 sps:$4 sm:$0xff]   ;;  %v4083_v55 = vpack.c.bf16 %v76_v42, %v70_v39  ;;  %v83_v56 = vld [vmem:[#allocation2 + $0xe8] sm:$0xff] }
  0xa0   :  { %2325 = vmatprep.subr.bf16.mxu1 %v3602_v57  ;;  %v89_v57 = vld [vmem:[#allocation2 + $0x118] sm:$0xff]  ;;  %v100_v39 = vld [vmem:[#allocation2 + $0x170] sm:$0xff] }
  0xa1   :  { %2061 = vmatmul.mubr.bf16.gmra.mxu0 %v4065_v60  ;;  %v3647_v42 = vld [vmem:[#allocation5 + $0x33c] ss:$24 sps:$4 sm:$0xff]  }
  0xa2   :  { %2174 = vmatmul.mubr.bf16.gmra.mxu1 %v4067_v61  ;;  %2213 = vmatpush2.bf16.msra.mxu0 %v3597_v0  ;;  %v4085_v0 = vpack.c.bf16 %v89_v57, %v83_v56  ;;  %v113_v56 = vld [vmem:[#allocation2 + $0x1d8] sm:$0xff] }
  0xa3   :  { %2326 = vmatpush2.bf16.msra.mxu1 %v3600_v3  ;;  %2214 = vmatprep.subr.bf16.mxu0 %v3605_v6  ;;  %v3627_v3 = vld [vmem:[#allocation5 + $0x3c8] ss:$24 sps:$4 sm:$0xff]   ;;  %v3648_v57 = vld [vmem:[#allocation5 + $0x638] ss:$24 sps:$4 sm:$0xff]  }
  0xa4   :  { %2327 = vmatprep.subr.bf16.mxu1 %v3608_v7  ;;  %2216 = vmatprep.mubr.bf16.mxu0 %v4069_v10  ;;  %v3630_v6 = vld [vmem:[#allocation5 + $0x6c8] ss:$24 sps:$4 sm:$0xff]  }
  0xa5   :  { %2329 = vmatprep.mubr.bf16.mxu1 %v3975_v53  ;;  %v82_v7 = vld [vmem:[#allocation2 + $0xe0] sm:$0xff] }
  0xa6   :  { %2215 = vmatpush2.bf16.msra.mxu0 %v3603_v8  ;;  %v88_v8 = vld [vmem:[#allocation2 + $0x110] sm:$0xff] }
  0xa7   :  { %2328 = vmatpush2.bf16.msra.mxu1 %v3606_v9  ;;  %2410 = vmatprep.subr.bf16.mxu0 %v3611_v19  ;;  %v3635_v9 = vld [vmem:[#allocation5 + $0x39c] ss:$24 sps:$4 sm:$0xff]   ;;  %v3636_v19 = vld [vmem:[#allocation5 + $0x698] ss:$24 sps:$4 sm:$0xff]  }
  0xa8   :  { %2523 = vmatprep.subr.bf16.mxu1 %v3614_v20  ;;  %v4091_v20 = vpack.c.bf16 %v88_v8, %v82_v7  ;;  %v106_v8 = vld [vmem:[#allocation2 + $0x1a0] sm:$0xff] }
  0xa9   :  { %2217 = vmatmul.mubr.bf16.vlgmr.msra.gmra.mxu0 %v4075_v22 }
  0xaa   :  { %2330 = vmatmul.mubr.bf16.vlgmr.msra.gmra.mxu1 %v3981_v16  ;;  %2411 = vmatpush1.bf16.msra.mxu0 %v3609_v21  ;;  %v95_v21 = vld [vmem:[#allocation2 + $0x148] sm:$0xff] }
  0xab   :  { %2524 = vmatpush1.bf16.msra.mxu1 %v3612_v27  ;;  %2412 = vmatprep.subr.bf16.mxu0 %v3617_v30  ;;  %v101_v27 = vld [vmem:[#allocation2 + $0x178] sm:$0xff]  ;;  %v3639_v30 = vld [vmem:[#allocation5 + $0x368] ss:$24 sps:$4 sm:$0xff]  }
  0xac   :  { %2525 = vmatprep.subr.bf16.mxu1 %v3620_v33  ;;  %2226 = vmatprep.mubr.bf16.mxu0 %v4077_v35  ;;  %v4093_v33 = vpack.c.bf16 %v101_v27, %v95_v21  ;;  %v3660_v21 = vld [vmem:[#allocation5 + $0x8d8] ss:$24 sps:$4 sm:$0xff]  }
  0xad   :  { %2339 = vmatprep.mubr.bf16.mxu1 %v3985_v23 }
  0xae   :  { %2413 = vmatpush1.bf16.msra.mxu0 %v3615_v34  ;;  %v3642_v34 = vld [vmem:[#allocation5 + $0x668] ss:$24 sps:$4 sm:$0xff]  }
  0xaf   :  { %2526 = vmatpush1.bf16.msra.mxu1 %v3618_v38  ;;  %2414 = vmatprep.subr.bf16.mxu0 %v3623_v45  ;;  %v94_v38 = vld [vmem:[#allocation2 + $0x140] sm:$0xff]  ;;  %v3650_v45 = vld [vmem:[#allocation5 + $0x63c] ss:$24 sps:$4 sm:$0xff]  }
  0xb0   :  { %2527 = vmatprep.subr.bf16.mxu1 %v3626_v48  ;;  %v3645_v48 = vld [vmem:[#allocation5 + $0x338] ss:$24 sps:$4 sm:$0xff]  }
  0xb1   :  { %2227 = vmatmul.mubr.bf16.gmra.mxu0 %v4083_v55 }
  0xb2   :  { %2340 = vmatmul.mubr.bf16.gmra.mxu1 %v3993_v36  ;;  %2415 = vmatpush1.bf16.msra.mxu0 %v3621_v51  ;;  %v4099_v51 = vpack.c.bf16 %v100_v39, %v94_v38  ;;  %v3663_v38 = vld [vmem:[#allocation5 + $0x5a8] ss:$24 sps:$4 sm:$0xff]  }
  0xb3   :  { %2528 = vmatpush1.bf16.msra.mxu1 %v3624_v52  ;;  %2416 = vmatprep.subr.bf16.mxu0 %v3629_v62  ;;  %v107_v52 = vld [vmem:[#allocation2 + $0x1a8] sm:$0xff] }
  0xb4   :  { %2529 = vmatprep.subr.bf16.mxu1 %v3632_v63  ;;  %2236 = vmatprep.mubr.bf16.mxu0 %v4085_v0  ;;  %4805 = vst [vmem:[#allocation12_spill] sm:$0xff] %v4099_v51  ;;  %v3653_v62 = vld [vmem:[#allocation5 + $0x30c] ss:$24 sps:$4 sm:$0xff]   ;;  %v4101_v7 = vpack.c.bf16 %v113_v56, %v107_v52  ;;  %v3666_v39 = vld [vmem:[#allocation5 + $0x8a8] ss:$24 sps:$4 sm:$0xff]  }
  0xb5   :  { %2349 = vmatprep.mubr.bf16.mxu1 %v3997_v43  ;;  %v3656_v63 = vld [vmem:[#allocation5 + $0x60c] ss:$24 sps:$4 sm:$0xff]   ;;  %v3671_v52 = vld [vmem:[#allocation5 + $0x57c] ss:$24 sps:$4 sm:$0xff]  }
  0xb6   :  { %2417 = vmatpush1.bf16.msra.mxu0 %v3627_v3  ;;  %v3651_v3 = vld [vmem:[#allocation5 + $0x308] ss:$24 sps:$4 sm:$0xff]   ;;  %v3674_v56 = vld [vmem:[#allocation5 + $0x87c] ss:$24 sps:$4 sm:$0xff]  }
  0xb7   :  { %2530 = vmatpush1.bf16.msra.mxu1 %v3630_v6  ;;  %2418 = vmatprep.subr.bf16.mxu0 %v3635_v9  ;;  %v3654_v6 = vld [vmem:[#allocation5 + $0x608] ss:$24 sps:$4 sm:$0xff]   ;;  %v112_v9 = vld [vmem:[#allocation2 + $0x1d0] sm:$0xff] }
  0xb8   :  { %2531 = vmatprep.subr.bf16.mxu1 %v3638_v11  ;;  %v3659_v11 = vld [vmem:[#allocation5 + $0x5dc] ss:$24 sps:$4 sm:$0xff]   ;;  %v4107_v27 = vpack.c.bf16 %v112_v9, %v106_v8  ;;  %v3677_v8 = vld [vmem:[#allocation5 + $0x54c] ss:$24 sps:$4 sm:$0xff]  }
  0xb9   :  { %2237 = vmatmul.mubr.bf16.gmra.mxu0 %v4091_v20  ;;  %v3680_v9 = vld [vmem:[#allocation5 + $0x84c] ss:$24 sps:$4 sm:$0xff]  }
  0xba   :  { %2350 = vmatmul.mubr.bf16.gmra.mxu1 %v4005_v58  ;;  %2419 = vmatpush1.bf16.msra.mxu0 %v3633_v18  ;;  %v3662_v18 = vld [vmem:[#allocation5 + $0x8dc] ss:$24 sps:$4 sm:$0xff]  }
  0xbb   :  { %2532 = vmatpush1.bf16.msra.mxu1 %v3636_v19  ;;  %2420 = vmatprep.subr.bf16.mxu0 %v3641_v28  ;;  %v3657_v19 = vld [vmem:[#allocation5 + $0x5d8] ss:$24 sps:$4 sm:$0xff]   ;;  %v119_v28 = vld [vmem:[#allocation2 + $0x208] sm:$0xff] }
  0xbc   :  { %2533 = vmatprep.subr.bf16.mxu1 %v3644_v29  ;;  %2246 = vmatprep.mubr.bf16.mxu0 %v4093_v33  ;;  %v125_v29 = vld [vmem:[#allocation2 + $0x238] sm:$0xff] }
  0xbd   :  { %2359 = vmatprep.mubr.bf16.mxu1 %v4009_v1 }
  0xbe   :  { %2421 = vmatpush1.bf16.msra.mxu0 %v3639_v30  ;;  %v3665_v30 = vld [vmem:[#allocation5 + $0x5ac] ss:$24 sps:$4 sm:$0xff]  }
  0xbf   :  { %2534 = vmatpush1.bf16.msra.mxu1 %v3642_v34  ;;  %2422 = vmatprep.subr.bf16.mxu0 %v3647_v42  ;;  %v3668_v34 = vld [vmem:[#allocation5 + $0x8ac] ss:$24 sps:$4 sm:$0xff]   ;;  %v4109_v42 = vpack.c.bf16 %v125_v29, %v119_v28  ;;  %v136_v28 = vld [vmem:[#allocation2 + $0x290] sm:$0xff] }
  0xc0   :  { %2535 = vmatprep.subr.bf16.mxu1 %v3650_v45  ;;  %v118_v45 = vld [vmem:[#allocation2 + $0x200] sm:$0xff]  ;;  %v3683_v29 = vld [vmem:[#allocation5 + $0x51c] ss:$24 sps:$4 sm:$0xff]  }
  0xc1   :  { %2247 = vmatmul.mubr.bf16.gmra.mxu0 %v4099_v51 }
  0xc2   :  { %2360 = vmatmul.mubr.bf16.gmra.mxu1 %v4017_v14  ;;  %2423 = vmatpush1.bf16.msra.mxu0 %v3645_v48  ;;  %v124_v48 = vld [vmem:[#allocation2 + $0x230] sm:$0xff] }
  0xc3   :  { %2536 = vmatpush1.bf16.msra.mxu1 %v3648_v57  ;;  %2424 = vmatprep.subr.bf16.mxu0 %v3653_v62  ;;  %v3669_v57 = vld [vmem:[#allocation5 + $0x578] ss:$24 sps:$4 sm:$0xff]  }
  0xc4   :  { %2537 = vmatprep.subr.bf16.mxu1 %v3656_v63  ;;  %2256 = vmatprep.mubr.bf16.mxu0 %v4101_v7  ;;  %v3672_v62 = vld [vmem:[#allocation5 + $0x878] ss:$24 sps:$4 sm:$0xff]   ;;  %v4115_v63 = vpack.c.bf16 %v124_v48, %v118_v45  ;;  %v143_v45 = vld [vmem:[#allocation2 + $0x2c8] sm:$0xff] }
  0xc5   :  { %2369 = vmatprep.mubr.bf16.mxu1 %v4021_v25  ;;  %v149_v48 = vld [vmem:[#allocation2 + $0x2f8] sm:$0xff] }
  0xc6   :  { %2425 = vmatpush1.bf16.msra.mxu0 %v3651_v3  ;;  %v131_v3 = vld [vmem:[#allocation2 + $0x268] sm:$0xff] }
  0xc7   :  { %2538 = vmatpush1.bf16.msra.mxu1 %v3654_v6  ;;  %2426 = vmatprep.subr.bf16.mxu0 %v3659_v11  ;;  %v137_v6 = vld [vmem:[#allocation2 + $0x298] sm:$0xff]  ;;  %v3675_v11 = vld [vmem:[#allocation5 + $0x548] ss:$24 sps:$4 sm:$0xff]  }
  0xc8   :  { %2539 = vmatprep.subr.bf16.mxu1 %v3662_v18  ;;  %v3678_v18 = vld [vmem:[#allocation5 + $0x848] ss:$24 sps:$4 sm:$0xff]  }
  0xc9   :  { %2257 = vmatmul.mubr.bf16.gmra.mxu0 %v4107_v27 }
  0xca   :  { %2370 = vmatmul.mubr.bf16.gmra.mxu1 %v4029_v40  ;;  %2427 = vmatpush2.bf16.msra.mxu0 %v3657_v19  ;;  %v4117_v19 = vpack.c.bf16 %v137_v6, %v131_v3  ;;  %v4125_v3 = vpack.c.bf16 %v149_v48, %v143_v45  ;;  %v142_v6 = vld [vmem:[#allocation2 + $0x2c0] sm:$0xff] }
  0xcb   :  { %2540 = vmatpush2.bf16.msra.mxu1 %v3660_v21  ;;  %2428 = vmatprep.subr.bf16.mxu0 %v3665_v30  ;;  %v130_v21 = vld [vmem:[#allocation2 + $0x260] sm:$0xff]  ;;  %v3686_v30 = vld [vmem:[#allocation5 + $0x81c] ss:$24 sps:$4 sm:$0xff]  }
  0xcc   :  { %2541 = vmatprep.subr.bf16.mxu1 %v3668_v34  ;;  %2266 = vmatprep.mubr.bf16.mxu0 %v4109_v42  ;;  %v3681_v34 = vld [vmem:[#allocation5 + $0x518] ss:$24 sps:$4 sm:$0xff]   ;;  %v3707_v45 = vld [vmem:[#allocation5 + $0x164] ss:$24 sps:$4 sm:$0xff]  }
  0xcd   :  { %2379 = vmatprep.mubr.bf16.mxu1 %v4033_v49  ;;  %v3710_v48 = vld [vmem:[#allocation5 + $0x464] ss:$24 sps:$4 sm:$0xff]  }
  0xce   :  { %2429 = vmatpush2.bf16.msra.mxu0 %v3663_v38  ;;  %v3684_v38 = vld [vmem:[#allocation5 + $0x818] ss:$24 sps:$4 sm:$0xff]  }
  0xcf   :  { %2542 = vmatpush2.bf16.msra.mxu1 %v3666_v39  ;;  %2430 = vmatprep.subr.bf16.mxu0 %v3671_v52  ;;  %v4123_v39 = vpack.c.bf16 %v136_v28, %v130_v21  ;;  %v3689_v52 = vld [vmem:[#allocation5 + $0x4ec] ss:$24 sps:$4 sm:$0xff]   ;;  %v3693_v21 = vld [vmem:[#allocation5 + $0x4b8] ss:$24 sps:$4 sm:$0xff]  }
  0xd0   :  { %2543 = vmatprep.subr.bf16.mxu1 %v3674_v56  ;;  %v3692_v56 = vld [vmem:[#allocation5 + $0x7ec] ss:$24 sps:$4 sm:$0xff]   ;;  %v3696_v28 = vld [vmem:[#allocation5 + $0x7b8] ss:$24 sps:$4 sm:$0xff]  }
  0xd1   :  { %2267 = vmatmul.mubr.bf16.gmra.mxu0 %v4115_v63 }
  0xd2   :  { %2380 = vmatmul.mubr.bf16.gmra.mxu1 %v4041_v4  ;;  %2431 = vmatpush2.bf16.msra.mxu0 %v3669_v57  ;;  %v3687_v57 = vld [vmem:[#allocation5 + $0x4e8] ss:$24 sps:$4 sm:$0xff]  }
  0xd3   :  { %2544 = vmatpush2.bf16.msra.mxu1 %v3672_v62  ;;  %2432 = vmatprep.subr.bf16.mxu0 %v3677_v8  ;;  %v3690_v62 = vld [vmem:[#allocation5 + $0x7e8] ss:$24 sps:$4 sm:$0xff]   ;;  %v148_v8 = vld [vmem:[#allocation2 + $0x2f0] sm:$0xff] }
  0xd4   :  { %2545 = vmatprep.subr.bf16.mxu1 %v3680_v9  ;;  %2276 = vmatprep.mubr.bf16.mxu0 %v4117_v19  ;;  %v3695_v9 = vld [vmem:[#allocation5 + $0x4bc] ss:$24 sps:$4 sm:$0xff]  }
  0xd5   :  { %2389 = vmatprep.mubr.bf16.mxu1 %v4045_v12 }
  0xd6   :  { %2433 = vmatpush2.bf16.msra.mxu0 %v3675_v11  ;;  %v3698_v11 = vld [vmem:[#allocation5 + $0x7bc] ss:$24 sps:$4 sm:$0xff]  }
  0xd7   :  { %2546 = vmatpush2.bf16.msra.mxu1 %v3678_v18  ;;  %2434 = vmatprep.subr.bf16.mxu0 %v3683_v29  ;;  %v4131_v18 = vpack.c.bf16 %v148_v8, %v142_v6  ;;  %v3701_v29 = vld [vmem:[#allocation5 + $0x48c] ss:$24 sps:$4 sm:$0xff]   ;;  %v3711_v6 = vld [vmem:[#allocation5 + $0x130] ss:$24 sps:$4 sm:$0xff]  }
  0xd8   :  { %2547 = vmatprep.subr.bf16.mxu1 %v3686_v30  ;;  %v3704_v30 = vld [vmem:[#allocation5 + $0x78c] ss:$24 sps:$4 sm:$0xff]   ;;  %v3714_v8 = vld [vmem:[#allocation5 + $0x430] ss:$24 sps:$4 sm:$0xff]  }
  0xd9   :  { %2277 = vmatmul.mubr.bf16.gmra.mxu0 %v4123_v39  ;;  %4806 = vst [vmem:[#allocation13_spill] sm:$0xff] %v4131_v18 }
  0xda   :  { %2390 = vmatmul.mubr.bf16.gmra.mxu1 %v4053_v31  ;;  %2435 = vmatpush2.bf16.msra.mxu0 %v3681_v34  ;;  %v3699_v34 = vld [vmem:[#allocation5 + $0x488] ss:$24 sps:$4 sm:$0xff]  }
  0xdb   :  { %2548 = vmatpush2.bf16.msra.mxu1 %v3684_v38  ;;  %2436 = vmatprep.subr.bf16.mxu0 %v3689_v52  ;;  %v3702_v38 = vld [vmem:[#allocation5 + $0x788] ss:$24 sps:$4 sm:$0xff]  }
  0xdc   :  { %2549 = vmatprep.subr.bf16.mxu1 %v3692_v56  ;;  %2286 = vmatprep.mubr.bf16.mxu0 %v4125_v3  ;;  %v3705_v52 = vld [vmem:[#allocation5 + $0x160] ss:$24 sps:$4 sm:$0xff]  }
  0xdd   :  { %2399 = vmatprep.mubr.bf16.mxu1 %v4057_v46  ;;  %v3708_v56 = vld [vmem:[#allocation5 + $0x460] ss:$24 sps:$4 sm:$0xff]  }
  0xde   :  { %2437 = vmatpush2.bf16.msra.mxu0 %v3687_v57  ;;  %v3713_v57 = vld [vmem:[#allocation5 + $0x134] ss:$24 sps:$4 sm:$0xff]  }
  0xdf   :  { %2550 = vmatpush2.bf16.msra.mxu1 %v3690_v62  ;;  %2438 = vmatprep.subr.bf16.mxu0 %v3695_v9  ;;  %v3716_v62 = vld [vmem:[#allocation5 + $0x434] ss:$24 sps:$4 sm:$0xff]   ;;  %v3719_v9 = vld [vmem:[#allocation5 + $0x104] ss:$24 sps:$4 sm:$0xff]  }
  0xe0   :  { %2551 = vmatprep.subr.bf16.mxu1 %v3698_v11  ;;  %v3722_v11 = vld [vmem:[#allocation5 + $0x404] ss:$24 sps:$4 sm:$0xff]  }
  0xe1   :  { %2287 = vmatmul.mubr.bf16.gmra.mxu0 %v4131_v18 }
  0xe2   :  { %2400 = vmatmul.mubr.bf16.gmra.mxu1 %v4065_v60  ;;  %2439 = vmatpush2.bf16.msra.mxu0 %v3693_v21  ;;  %v3717_v21 = vld [vmem:[#allocation5 + $0x100] ss:$24 sps:$4 sm:$0xff]  }
  0xe3   :  { %2552 = vmatpush2.bf16.msra.mxu1 %v3696_v28  ;;  %2440 = vmatprep.subr.bf16.mxu0 %v3701_v29  ;;  %v3720_v28 = vld [vmem:[#allocation5 + $0x400] ss:$24 sps:$4 sm:$0xff]   ;;  %v3725_v29 = vld [vmem:[#allocation5 + $0xd4] ss:$24 sps:$4 sm:$0xff]  }
  0xe4   :  { %2553 = vmatprep.subr.bf16.mxu1 %v3704_v30  ;;  %2442 = vmatprep.mubr.bf16.mxu0 %v3977_v54  ;;  %v3728_v30 = vld [vmem:[#allocation5 + $0x3d4] ss:$24 sps:$4 sm:$0xff]  }
  0xe5   :  { %2555 = vmatprep.mubr.bf16.mxu1 %v4069_v10 }
  0xe6   :  { %2441 = vmatpush2.bf16.msra.mxu0 %v3699_v34  ;;  %v3723_v34 = vld [vmem:[#allocation5 + $0xd0] ss:$24 sps:$4 sm:$0xff]  }
  0xe7   :  { %2554 = vmatpush2.bf16.msra.mxu1 %v3702_v38  ;;  %2636 = vmatprep.subr.bf16.mxu0 %v3707_v45  ;;  %v3726_v38 = vld [vmem:[#allocation5 + $0x3d0] ss:$24 sps:$4 sm:$0xff]   ;;  %v3731_v45 = vld [vmem:[#allocation5 + $0xa4] ss:$24 sps:$4 sm:$0xff]  }
  0xe8   :  { %2749 = vmatprep.subr.bf16.mxu1 %v3710_v48  ;;  %v3734_v48 = vld [vmem:[#allocation5 + $0x3a4] ss:$24 sps:$4 sm:$0xff]  }
  0xe9   :  { %2443 = vmatmul.mubr.bf16.vlgmr.msra.gmra.mxu0 %v3983_v17 }
  0xea   :  { %2556 = vmatmul.mubr.bf16.vlgmr.msra.gmra.mxu1 %v4075_v22  ;;  %2637 = vmatpush1.bf16.msra.mxu0 %v3705_v52  ;;  %v3729_v52 = vld [vmem:[#allocation5 + $0xa0] ss:$24 sps:$4 sm:$0xff]  }
  0xeb   :  { %2750 = vmatpush1.bf16.msra.mxu1 %v3708_v56  ;;  %2638 = vmatprep.subr.bf16.mxu0 %v3713_v57  ;;  %v3732_v56 = vld [vmem:[#allocation5 + $0x3a0] ss:$24 sps:$4 sm:$0xff]   ;;  %v3737_v57 = vld [vmem:[#allocation5 + $0x74] ss:$24 sps:$4 sm:$0xff]  }
  0xec   :  { %2751 = vmatprep.subr.bf16.mxu1 %v3716_v62  ;;  %2452 = vmatprep.mubr.bf16.mxu0 %v3987_v24  ;;  %v3740_v62 = vld [vmem:[#allocation5 + $0x374] ss:$24 sps:$4 sm:$0xff]  }
  0xed   :  { %2565 = vmatprep.mubr.bf16.mxu1 %v4077_v35 }
  0xee   :  { %2639 = vmatpush1.bf16.msra.mxu0 %v3711_v6  ;;  %v3735_v6 = vld [vmem:[#allocation5 + $0x70] ss:$24 sps:$4 sm:$0xff]  }
  0xef   :  { %2752 = vmatpush1.bf16.msra.mxu1 %v3714_v8  ;;  %2640 = vmatprep.subr.bf16.mxu0 %v3719_v9  ;;  %v3738_v8 = vld [vmem:[#allocation5 + $0x370] ss:$24 sps:$4 sm:$0xff]   ;;  %v3743_v9 = vld [vmem:[#allocation5 + $0x44] ss:$24 sps:$4 sm:$0xff]  }
  0xf0   :  { %2753 = vmatprep.subr.bf16.mxu1 %v3722_v11  ;;  %v3746_v11 = vld [vmem:[#allocation5 + $0x344] ss:$24 sps:$4 sm:$0xff]  }
  0xf1   :  { %2453 = vmatmul.mubr.bf16.gmra.mxu0 %v3995_v37 }
  0xf2   :  { %2566 = vmatmul.mubr.bf16.gmra.mxu1 %v4083_v55  ;;  %2641 = vmatpush1.bf16.msra.mxu0 %v3717_v21  ;;  %v3741_v21 = vld [vmem:[#allocation5 + $0x40] ss:$24 sps:$4 sm:$0xff]  }
  0xf3   :  { %2754 = vmatpush1.bf16.msra.mxu1 %v3720_v28  ;;  %2642 = vmatprep.subr.bf16.mxu0 %v3725_v29  ;;  %v3744_v28 = vld [vmem:[#allocation5 + $0x340] ss:$24 sps:$4 sm:$0xff]   ;;  %v3749_v29 = vld [vmem:[#allocation5 + $0x14] ss:$24 sps:$4 sm:$0xff]  }
  0xf4   :  { %2755 = vmatprep.subr.bf16.mxu1 %v3728_v30  ;;  %2462 = vmatprep.mubr.bf16.mxu0 %v3999_v44  ;;  %v3752_v30 = vld [vmem:[#allocation5 + $0x314] ss:$24 sps:$4 sm:$0xff]  }
  0xf5   :  { %2575 = vmatprep.mubr.bf16.mxu1 %v4085_v0 }
  0xf6   :  { %2643 = vmatpush1.bf16.msra.mxu0 %v3723_v34  ;;  %v3747_v34 = vld [vmem:[#allocation5 + $0x10] ss:$24 sps:$4 sm:$0xff]  }
  0xf7   :  { %2756 = vmatpush1.bf16.msra.mxu1 %v3726_v38  ;;  %2644 = vmatprep.subr.bf16.mxu0 %v3731_v45  ;;  %v3750_v38 = vld [vmem:[#allocation5 + $0x310] ss:$24 sps:$4 sm:$0xff]   ;;  %v3755_v45 = vld [vmem:[#allocation5 + $0x2e4] ss:$24 sps:$4 sm:$0xff]  }
  0xf8   :  { %2757 = vmatprep.subr.bf16.mxu1 %v3734_v48  ;;  %v3758_v48 = vld [vmem:[#allocation5 + $0x5e4] ss:$24 sps:$4 sm:$0xff]  }
  0xf9   :  { %2463 = vmatmul.mubr.bf16.gmra.mxu0 %v4007_v59 }
  0xfa   :  { %2576 = vmatmul.mubr.bf16.gmra.mxu1 %v4091_v20  ;;  %2645 = vmatpush1.bf16.msra.mxu0 %v3729_v52  ;;  %v3753_v52 = vld [vmem:[#allocation5 + $0x2e0] ss:$24 sps:$4 sm:$0xff]  }
  0xfb   :  { %2758 = vmatpush1.bf16.msra.mxu1 %v3732_v56  ;;  %2646 = vmatprep.subr.bf16.mxu0 %v3737_v57  ;;  %v3756_v56 = vld [vmem:[#allocation5 + $0x5e0] ss:$24 sps:$4 sm:$0xff]   ;;  %v3761_v57 = vld [vmem:[#allocation5 + $0x2b4] ss:$24 sps:$4 sm:$0xff]  }
  0xfc   :  { %2759 = vmatprep.subr.bf16.mxu1 %v3740_v62  ;;  %2472 = vmatprep.mubr.bf16.mxu0 %v4011_v2  ;;  %v3764_v62 = vld [vmem:[#allocation5 + $0x5b4] ss:$24 sps:$4 sm:$0xff]  }
  0xfd   :  { %2585 = vmatprep.mubr.bf16.mxu1 %v4093_v33 }
  0xfe   :  { %2647 = vmatpush1.bf16.msra.mxu0 %v3735_v6  ;;  %v3759_v6 = vld [vmem:[#allocation5 + $0x2b0] ss:$24 sps:$4 sm:$0xff]  }
  0xff   :  { %2760 = vmatpush1.bf16.msra.mxu1 %v3738_v8  ;;  %2648 = vmatprep.subr.bf16.mxu0 %v3743_v9  ;;  %v3762_v8 = vld [vmem:[#allocation5 + $0x5b0] ss:$24 sps:$4 sm:$0xff]   ;;  %v3767_v9 = vld [vmem:[#allocation5 + $0x284] ss:$24 sps:$4 sm:$0xff]  }
 0x100   :  { %2761 = vmatprep.subr.bf16.mxu1 %v3746_v11  ;;  %v3770_v11 = vld [vmem:[#allocation5 + $0x584] ss:$24 sps:$4 sm:$0xff]  }
 0x101   :  { %2473 = vmatmul.mubr.bf16.gmra.mxu0 %v4019_v15 }
 0x102   :  { %2586 = vmatmul.mubr.bf16.gmra.mxu1 %v4099_v51  ;;  %2649 = vmatpush1.bf16.msra.mxu0 %v3741_v21  ;;  %v3765_v21 = vld [vmem:[#allocation5 + $0x280] ss:$24 sps:$4 sm:$0xff]  }
 0x103   :  { %2762 = vmatpush1.bf16.msra.mxu1 %v3744_v28  ;;  %2650 = vmatprep.subr.bf16.mxu0 %v3749_v29  ;;  %v3768_v28 = vld [vmem:[#allocation5 + $0x580] ss:$24 sps:$4 sm:$0xff]   ;;  %v3773_v29 = vld [vmem:[#allocation5 + $0x254] ss:$24 sps:$4 sm:$0xff]  }
 0x104   :  { %2763 = vmatprep.subr.bf16.mxu1 %v3752_v30  ;;  %2482 = vmatprep.mubr.bf16.mxu0 %v4023_v26  ;;  %v3776_v30 = vld [vmem:[#allocation5 + $0x554] ss:$24 sps:$4 sm:$0xff]  }
 0x105   :  { %2595 = vmatprep.mubr.bf16.mxu1 %v4101_v7 }
 0x106   :  { %2651 = vmatpush1.bf16.msra.mxu0 %v3747_v34  ;;  %v3771_v34 = vld [vmem:[#allocation5 + $0x250] ss:$24 sps:$4 sm:$0xff]  }
 0x107   :  { %2764 = vmatpush1.bf16.msra.mxu1 %v3750_v38  ;;  %2652 = vmatprep.subr.bf16.mxu0 %v3755_v45  ;;  %v3774_v38 = vld [vmem:[#allocation5 + $0x550] ss:$24 sps:$4 sm:$0xff]   ;;  %v3779_v45 = vld [vmem:[#allocation5 + $0x224] ss:$24 sps:$4 sm:$0xff]  }
 0x108   :  { %2765 = vmatprep.subr.bf16.mxu1 %v3758_v48  ;;  %v3782_v48 = vld [vmem:[#allocation5 + $0x524] ss:$24 sps:$4 sm:$0xff]  }
 0x109   :  { %2483 = vmatmul.mubr.bf16.gmra.mxu0 %v4031_v41 }
 0x10a   :  { %2596 = vmatmul.mubr.bf16.gmra.mxu1 %v4107_v27  ;;  %2653 = vmatpush2.bf16.msra.mxu0 %v3753_v52  ;;  %v3777_v52 = vld [vmem:[#allocation5 + $0x220] ss:$24 sps:$4 sm:$0xff]  }
 0x10b   :  { %2766 = vmatpush2.bf16.msra.mxu1 %v3756_v56  ;;  %2654 = vmatprep.subr.bf16.mxu0 %v3761_v57  ;;  %v3780_v56 = vld [vmem:[#allocation5 + $0x520] ss:$24 sps:$4 sm:$0xff]   ;;  %v3785_v57 = vld [vmem:[#allocation5 + $0x1f4] ss:$24 sps:$4 sm:$0xff]  }
 0x10c   :  { %2767 = vmatprep.subr.bf16.mxu1 %v3764_v62  ;;  %2492 = vmatprep.mubr.bf16.mxu0 %v4035_v50  ;;  %v3788_v62 = vld [vmem:[#allocation5 + $0x4f4] ss:$24 sps:$4 sm:$0xff]  }
 0x10d   :  { %2605 = vmatprep.mubr.bf16.mxu1 %v4109_v42 }
 0x10e   :  { %2655 = vmatpush2.bf16.msra.mxu0 %v3759_v6  ;;  %v3783_v6 = vld [vmem:[#allocation5 + $0x1f0] ss:$24 sps:$4 sm:$0xff]  }
 0x10f   :  { %2768 = vmatpush2.bf16.msra.mxu1 %v3762_v8  ;;  %2656 = vmatprep.subr.bf16.mxu0 %v3767_v9  ;;  %v3786_v8 = vld [vmem:[#allocation5 + $0x4f0] ss:$24 sps:$4 sm:$0xff]   ;;  %v3791_v9 = vld [vmem:[#allocation5 + $0x1c4] ss:$24 sps:$4 sm:$0xff]  }
 0x110   :  { %2769 = vmatprep.subr.bf16.mxu1 %v3770_v11  ;;  %v3794_v11 = vld [vmem:[#allocation5 + $0x4c4] ss:$24 sps:$4 sm:$0xff]  }
 0x111   :  { %2493 = vmatmul.mubr.bf16.gmra.mxu0 %v4043_v5 }
 0x112   :  { %2606 = vmatmul.mubr.bf16.gmra.mxu1 %v4115_v63  ;;  %2657 = vmatpush2.bf16.msra.mxu0 %v3765_v21  ;;  %v3789_v21 = vld [vmem:[#allocation5 + $0x1c0] ss:$24 sps:$4 sm:$0xff]  }
 0x113   :  { %2770 = vmatpush2.bf16.msra.mxu1 %v3768_v28  ;;  %2658 = vmatprep.subr.bf16.mxu0 %v3773_v29  ;;  %v3792_v28 = vld [vmem:[#allocation5 + $0x4c0] ss:$24 sps:$4 sm:$0xff]   ;;  %v3797_v29 = vld [vmem:[#allocation5 + $0x194] ss:$24 sps:$4 sm:$0xff]  }
 0x114   :  { %2771 = vmatprep.subr.bf16.mxu1 %v3776_v30  ;;  %2502 = vmatprep.mubr.bf16.mxu0 %v4047_v13  ;;  %v3800_v30 = vld [vmem:[#allocation5 + $0x494] ss:$24 sps:$4 sm:$0xff]  }
 0x115   :  { %2615 = vmatprep.mubr.bf16.mxu1 %v4117_v19 }
 0x116   :  { %2659 = vmatpush2.bf16.msra.mxu0 %v3771_v34  ;;  %v3795_v34 = vld [vmem:[#allocation5 + $0x190] ss:$24 sps:$4 sm:$0xff]  }
 0x117   :  { %2772 = vmatpush2.bf16.msra.mxu1 %v3774_v38  ;;  %2660 = vmatprep.subr.bf16.mxu0 %v3779_v45  ;;  %v3798_v38 = vld [vmem:[#allocation5 + $0x490] ss:$24 sps:$4 sm:$0xff]   ;;  %v3803_v45 = vld [vmem:[#allocation5 + $0x764] ss:$24 sps:$4 sm:$0xff]  }
 0x118   :  { %2773 = vmatprep.subr.bf16.mxu1 %v3782_v48  ;;  %v3801_v48 = vld [vmem:[#allocation5 + $0x760] ss:$24 sps:$4 sm:$0xff]  }
 0x119   :  { %2503 = vmatmul.mubr.bf16.gmra.mxu0 %v4055_v32 }
 0x11a   :  { %2616 = vmatmul.mubr.bf16.gmra.mxu1 %v4123_v39  ;;  %2661 = vmatpush2.bf16.msra.mxu0 %v3777_v52  ;;  %v3806_v52 = vld [vmem:[#allocation5 + $0x734] ss:$24 sps:$4 sm:$0xff]  }
 0x11b   :  { %2774 = vmatpush2.bf16.msra.mxu1 %v3780_v56  ;;  %2662 = vmatprep.subr.bf16.mxu0 %v3785_v57 }
 0x11c   :  { %2775 = vmatprep.subr.bf16.mxu1 %v3788_v62  ;;  %2512 = vmatprep.mubr.bf16.mxu0 %v4059_v47  ;;  %v3804_v62 = vld [vmem:[#allocation5 + $0x730] ss:$24 sps:$4 sm:$0xff]  }
 0x11d   :  { %2625 = vmatprep.mubr.bf16.mxu1 %v4125_v3 }
 0x11e   :  { %2663 = vmatpush2.bf16.msra.mxu0 %v3783_v6  ;;  %v3809_v6 = vld [vmem:[#allocation5 + $0x704] ss:$24 sps:$4 sm:$0xff]  }
 0x11f   :  { %2776 = vmatpush2.bf16.msra.mxu1 %v3786_v8  ;;  %2664 = vmatprep.subr.bf16.mxu0 %v3791_v9 }
 0x120   :  { %2777 = vmatprep.subr.bf16.mxu1 %v3794_v11 }
 0x121   :  { %2513 = vmatmul.mubr.bf16.gmra.mxu0 %v4067_v61 }
 0x122   :  { %2626 = vmatmul.mubr.bf16.gmra.mxu1 %v4131_v18  ;;  %2665 = vmatpush2.bf16.msra.mxu0 %v3789_v21  ;;  %v3812_v21 = vld [vmem:[#allocation5 + $0x6d4] ss:$24 sps:$4 sm:$0xff]  }
 0x123   :  { %2778 = vmatpush2.bf16.msra.mxu1 %v3792_v28  ;;  %2666 = vmatprep.subr.bf16.mxu0 %v3797_v29  ;;  %v3824_v18 = vld [vmem:[#allocation5 + $0x614] ss:$24 sps:$4 sm:$0xff]  }
 0x124   :  { %2779 = vmatprep.subr.bf16.mxu1 %v3800_v30  ;;  %2668 = vmatprep.mubr.bf16.mxu0 %v3975_v53 }
 0x125   :  { %2781 = vmatprep.mubr.bf16.mxu1 %v3977_v54 }
 0x126   :  { %2667 = vmatpush2.bf16.msra.mxu0 %v3795_v34  ;;  %v3815_v34 = vld [vmem:[#allocation5 + $0x6a4] ss:$24 sps:$4 sm:$0xff]  }
 0x127   :  { %2780 = vmatpush2.bf16.msra.mxu1 %v3798_v38  ;;  %2862 = vmatprep.subr.bf16.mxu0 %v3803_v45 }
 0x128   :  { %3377 = vmatprep.subr.bf16.mxu1 %v3803_v45 }
 0x129   :  { %v4169_v56 = vpop.f32.mrf.mxu0  ;;  %2669 = vmatmul.mubr.bf16.vlgmr.msra.gmra.mxu0 %v3981_v16  ;;  %v3807_v16 = vld [vmem:[#allocation5 + $0x700] ss:$24 sps:$4 sm:$0xff]  }
 0x12a   :  { %v4171_v57 = vpop.f32.mrf.mxu1  ;;  %2782 = vmatmul.mubr.bf16.vlgmr.msra.gmra.mxu1 %v3983_v17  ;;  %2863 = vmatpush1.bf16.msra.mxu0 %v3801_v48 }
 0x12b   :  { %3393 = vmatpush1.bf16.msra.mxu1 %v3801_v48  ;;  %v4175_v53 = vpop.f32.mrf.mxu0  ;;  %2864 = vmatprep.subr.bf16.mxu0 %v3806_v52 }
 0x12c   :  { %v4177_v54 = vpop.f32.mrf.mxu1  ;;  %3378 = vmatprep.subr.bf16.mxu1 %v3806_v52  ;;  %2678 = vmatprep.mubr.bf16.mxu0 %v3985_v23  ;;  %v3810_v23 = vld [vmem:[#allocation5 + $0x6d0] ss:$24 sps:$4 sm:$0xff]   ;;  %v3818_v52 = vld [vmem:[#allocation5 + $0x674] ss:$24 sps:$4 sm:$0xff]  }
 0x12d   :  { %2791 = vmatprep.mubr.bf16.mxu1 %v3987_v24  ;;  %v4181_v8 = vpop.f32.mrf.mxu0 }
 0x12e   :  { %v4183_v9 = vpop.f32.mrf.mxu1  ;;  %2865 = vmatpush1.bf16.msra.mxu0 %v3804_v62 }
 0x12f   :  { %3394 = vmatpush1.bf16.msra.mxu1 %v3804_v62  ;;  %v4185_v17 = vpop.f32.mrf.mxu0  ;;  %2866 = vmatprep.subr.bf16.mxu0 %v3809_v6 }
 0x130   :  { %v4187_v11 = vpop.f32.mrf.mxu1  ;;  %3379 = vmatprep.subr.bf16.mxu1 %v3809_v6 }
 0x131   :  { %v4189_v28 = vpop.f32.mrf.mxu0  ;;  %2679 = vmatmul.mubr.bf16.gmra.mxu0 %v3993_v36  ;;  %v3813_v36 = vld [vmem:[#allocation5 + $0x6a0] ss:$24 sps:$4 sm:$0xff]  }
 0x132   :  { %v4191_v29 = vpop.f32.mrf.mxu1  ;;  %2792 = vmatmul.mubr.bf16.gmra.mxu1 %v3995_v37  ;;  %2867 = vmatpush1.bf16.msra.mxu0 %v3807_v16 }
 0x133   :  { %3395 = vmatpush1.bf16.msra.mxu1 %v3807_v16  ;;  %v4195_v24 = vpop.f32.mrf.mxu0  ;;  %2868 = vmatprep.subr.bf16.mxu0 %v3812_v21 }
 0x134   :  { %v4197_v30 = vpop.f32.mrf.mxu1  ;;  %3380 = vmatprep.subr.bf16.mxu1 %v3812_v21  ;;  %2688 = vmatprep.mubr.bf16.mxu0 %v3997_v43  ;;  %v3816_v43 = vld [vmem:[#allocation5 + $0x670] ss:$24 sps:$4 sm:$0xff]   ;;  %v3821_v21 = vld [vmem:[#allocation5 + $0x644] ss:$24 sps:$4 sm:$0xff]  }
 0x135   :  { %2801 = vmatprep.mubr.bf16.mxu1 %v3999_v44  ;;  %v4201_v38 = vpop.f32.mrf.mxu0 }
 0x136   :  { %v4203_v45 = vpop.f32.mrf.mxu1  ;;  %2869 = vmatpush1.bf16.msra.mxu0 %v3810_v23 }
 0x137   :  { %3396 = vmatpush1.bf16.msra.mxu1 %v3810_v23  ;;  %v4205_v37 = vpop.f32.mrf.mxu0  ;;  %2870 = vmatprep.subr.bf16.mxu0 %v3815_v34 }
 0x138   :  { %v4207_v48 = vpop.f32.mrf.mxu1  ;;  %3381 = vmatprep.subr.bf16.mxu1 %v3815_v34 }
 0x139   :  { %v4209_v62 = vpop.f32.mrf.mxu0  ;;  %2689 = vmatmul.mubr.bf16.gmra.mxu0 %v4005_v58  ;;  %v3819_v58 = vld [vmem:[#allocation5 + $0x640] ss:$24 sps:$4 sm:$0xff]  }
 0x13a   :  { %v4211_v6 = vpop.f32.mrf.mxu1  ;;  %2802 = vmatmul.mubr.bf16.gmra.mxu1 %v4007_v59  ;;  %2871 = vmatpush1.bf16.msra.mxu0 %v3813_v36 }
 0x13b   :  { %3397 = vmatpush1.bf16.msra.mxu1 %v3813_v36  ;;  %v4215_v44 = vpop.f32.mrf.mxu0  ;;  %2872 = vmatprep.subr.bf16.mxu0 %v3818_v52 }
 0x13c   :  { %v4217_v16 = vpop.f32.mrf.mxu1  ;;  %3382 = vmatprep.subr.bf16.mxu1 %v3818_v52  ;;  %2698 = vmatprep.mubr.bf16.mxu0 %v4009_v1  ;;  %v3822_v1 = vld [vmem:[#allocation5 + $0x610] ss:$24 sps:$4 sm:$0xff]  }
 0x13d   :  { %2811 = vmatprep.mubr.bf16.mxu1 %v4011_v2  ;;  %v4221_v23 = vpop.f32.mrf.mxu0 }
 0x13e   :  { %v4223_v34 = vpop.f32.mrf.mxu1  ;;  %2873 = vmatpush1.bf16.msra.mxu0 %v3816_v43 }
 0x13f   :  { %3398 = vmatpush1.bf16.msra.mxu1 %v3816_v43  ;;  %v4225_v59 = vpop.f32.mrf.mxu0  ;;  %2874 = vmatprep.subr.bf16.mxu0 %v3821_v21 }
 0x140   :  { %v4227_v36 = vpop.f32.mrf.mxu1  ;;  %3383 = vmatprep.subr.bf16.mxu1 %v3821_v21 }
 0x141   :  { %4807 = vst [vmem:[#allocation14_spill] sm:$0xff] %v4227_v36  ;;  %v4229_v52 = vpop.f32.mrf.mxu0  ;;  %2699 = vmatmul.mubr.bf16.gmra.mxu0 %v4017_v14  ;;  %v3827_v36 = vld [vmem:[#allocation5 + $0x8e4] ss:$24 sps:$4 sm:$0xff]   ;;  %v3825_v14 = vld [vmem:[#allocation5 + $0x8e0] ss:$24 sps:$4 sm:$0xff]  }
 0x142   :  { %v4231_v51 = vpop.f32.mrf.mxu1  ;;  %2812 = vmatmul.mubr.bf16.gmra.mxu1 %v4019_v15  ;;  %2875 = vmatpush1.bf16.msra.mxu0 %v3819_v58 }
 0x143   :  { %4808 = vst [vmem:[#allocation15_spill] sm:$0xff] %v4231_v51  ;;  %3399 = vmatpush1.bf16.msra.mxu1 %v3819_v58  ;;  %v4235_v2 = vpop.f32.mrf.mxu0  ;;  %2876 = vmatprep.subr.bf16.mxu0 %v3824_v18 }
 0x144   :  { %4809 = vst [vmem:[#allocation16_spill] sm:$0xff] %v4235_v2  ;;  %v4237_v43 = vpop.f32.mrf.mxu1  ;;  %3384 = vmatprep.subr.bf16.mxu1 %v3824_v18  ;;  %2708 = vmatprep.mubr.bf16.mxu0 %v4021_v25  ;;  %v3828_v25 = vld [vmem:[#allocation5 + $0x8b0] ss:$24 sps:$4 sm:$0xff]  }
 0x145   :  { %4810 = vst [vmem:[#allocation17_spill] sm:$0xff] %v4237_v43  ;;  %2821 = vmatprep.mubr.bf16.mxu1 %v4023_v26  ;;  %v4241_v21 = vpop.f32.mrf.mxu0  ;;  %v3830_v43 = vld [vmem:[#allocation5 + $0x8b4] ss:$24 sps:$4 sm:$0xff]  }
 0x146   :  { %v4243_v51 = vpop.f32.mrf.mxu1  ;;  %2877 = vmatpush1.bf16.msra.mxu0 %v3822_v1 }
 0x147   :  { %3400 = vmatpush1.bf16.msra.mxu1 %v3822_v1  ;;  %v4245_v15 = vpop.f32.mrf.mxu0  ;;  %2878 = vmatprep.subr.bf16.mxu0 %v3827_v36 }
 0x148   :  { %v4247_v58 = vpop.f32.mrf.mxu1  ;;  %3385 = vmatprep.subr.bf16.mxu1 %v3827_v36 }
 0x149   :  { %4811 = vst [vmem:[#allocation18_spill] sm:$0xff] %v4247_v58  ;;  %v4249_v18 = vpop.f32.mrf.mxu0  ;;  %2709 = vmatmul.mubr.bf16.gmra.mxu0 %v4029_v40  ;;  %v3833_v58 = vld [vmem:[#allocation5 + $0x884] ss:$24 sps:$4 sm:$0xff]   ;;  %v3831_v40 = vld [vmem:[#allocation5 + $0x880] ss:$24 sps:$4 sm:$0xff]  }
 0x14a   :  { %v4251_v2 = vpop.f32.mrf.mxu1  ;;  %2822 = vmatmul.mubr.bf16.gmra.mxu1 %v4031_v41  ;;  %2879 = vmatpush2.bf16.msra.mxu0 %v3825_v14 }
 0x14b   :  { %4812 = vst [vmem:[#allocation19_spill] sm:$0xff] %v4251_v2  ;;  %3401 = vmatpush2.bf16.msra.mxu1 %v3825_v14  ;;  %v4255_v26 = vpop.f32.mrf.mxu0  ;;  %2880 = vmatprep.subr.bf16.mxu0 %v3830_v43 }
 0x14c   :  { %4813 = vst [vmem:[#allocation20_spill] sm:$0xff] %v4255_v26  ;;  %v4257_v1 = vpop.f32.mrf.mxu1  ;;  %3386 = vmatprep.subr.bf16.mxu1 %v3830_v43  ;;  %2718 = vmatprep.mubr.bf16.mxu0 %v4033_v49  ;;  %v3834_v49 = vld [vmem:[#allocation5 + $0x850] ss:$24 sps:$4 sm:$0xff]  }
 0x14d   :  { %4814 = vst [vmem:[#allocation21_spill] sm:$0xff] %v4257_v1  ;;  %2831 = vmatprep.mubr.bf16.mxu1 %v4035_v50  ;;  %v4261_v36 = vpop.f32.mrf.mxu0  ;;  %v3836_v1 = vld [vmem:[#allocation5 + $0x854] ss:$24 sps:$4 sm:$0xff]  }
 0x14e   :  { %v4263_v2 = vpop.f32.mrf.mxu1  ;;  %2881 = vmatpush2.bf16.msra.mxu0 %v3828_v25 }
 0x14f   :  { %3402 = vmatpush2.bf16.msra.mxu1 %v3828_v25  ;;  %v4265_v41 = vpop.f32.mrf.mxu0  ;;  %2882 = vmatprep.subr.bf16.mxu0 %v3833_v58 }
 0x150   :  { %v4267_v14 = vpop.f32.mrf.mxu1  ;;  %3387 = vmatprep.subr.bf16.mxu1 %v3833_v58  ;;  %v488_v58 = vlaneseq }
 0x151   :  { %4815 = vst [vmem:[#allocation22_spill] sm:$0xff] %v4267_v14  ;;  %v4269_v43 = vpop.f32.mrf.mxu0  ;;  %2719 = vmatmul.mubr.bf16.gmra.mxu0 %v4041_v4  ;;  %v3839_v14 = vld [vmem:[#allocation5 + $0x824] ss:$24 sps:$4 sm:$0xff]  }
 0x152   :  { %4816 = vst [vmem:[#allocation23_spill] sm:$0xff] %v4269_v43  ;;  %v4271_v26 = vpop.f32.mrf.mxu1  ;;  %2832 = vmatmul.mubr.bf16.gmra.mxu1 %v4043_v5  ;;  %2883 = vmatpush2.bf16.msra.mxu0 %v3831_v40  ;;  %v3837_v5 = vld [vmem:[#allocation5 + $0x820] ss:$24 sps:$4 sm:$0xff]  }
 0x153   :  { %4817 = vst [vmem:[#allocation24_spill] sm:$0xff] %v4271_v26  ;;  %3403 = vmatpush2.bf16.msra.mxu1 %v3831_v40  ;;  %v4275_v50 = vpop.f32.mrf.mxu0  ;;  %2884 = vmatprep.subr.bf16.mxu0 %v3836_v1 }
 0x154   :  { %4818 = vst [vmem:[#allocation25_spill] sm:$0xff] %v4275_v50  ;;  %v4277_v25 = vpop.f32.mrf.mxu1  ;;  %3388 = vmatprep.subr.bf16.mxu1 %v3836_v1  ;;  %2728 = vmatprep.mubr.bf16.mxu0 %v4045_v12  ;;  %v3842_v1 = vld [vmem:[#allocation5 + $0x7f4] ss:$24 sps:$4 sm:$0xff]  }
 0x155   :  { %4819 = vst [vmem:[#allocation26_spill] sm:$0xff] %v4277_v25  ;;  %2841 = vmatprep.mubr.bf16.mxu1 %v4047_v13  ;;  %v4281_v26 = vpop.f32.mrf.mxu0  ;;  %v4289_v25 = vshrl.u32 %v488_v58, 7  ;;  %v3840_v13 = vld [vmem:[#allocation5 + $0x7f0] ss:$24 sps:$4 sm:$0xff]  }
 0x156   :  { %v4283_v4 = vpop.f32.mrf.mxu1  ;;  %2885 = vmatpush2.bf16.msra.mxu0 %v3834_v49 }
 0x157   :  { %4820 = vst [vmem:[#allocation27_spill] sm:$0xff] %v4283_v4  ;;  %3404 = vmatpush2.bf16.msra.mxu1 %v3834_v49  ;;  %v4285_v40 = vpop.f32.mrf.mxu0  ;;  %2886 = vmatprep.subr.bf16.mxu0 %v3839_v14  ;;  %4822 = vst [vmem:[#allocation29_spill] sm:$0xff] %v4289_v25  ;;  %v490_v58 = vsub.s32 0, %v4289_v25 }
 0x158   :  { %v4287_v50 = vpop.f32.mrf.mxu1  ;;  %3389 = vmatprep.subr.bf16.mxu1 %v3839_v14  ;;  %v3845_v14 = vld [vmem:[#allocation5 + $0x7c4] ss:$24 sps:$4 sm:$0xff]  }
 0x159   :  { %4821 = vst [vmem:[#allocation28_spill] sm:$0xff] %v4287_v50  ;;  %v4291_v43 = vpop.f32.mrf.mxu0  ;;  %2729 = vmatmul.mubr.bf16.gmra.mxu0 %v4053_v31 }
 0x15a   :  { %v4293_v12 = vpop.f32.mrf.mxu1  ;;  %2842 = vmatmul.mubr.bf16.gmra.mxu1 %v4055_v32  ;;  %2887 = vmatpush2.bf16.msra.mxu0 %v3837_v5 }
 0x15b   :  { %4823 = vst [vmem:[#allocation30_spill] sm:$0xff] %v4293_v12  ;;  %3405 = vmatpush2.bf16.msra.mxu1 %v3837_v5  ;;  %v4297_v49 = vpop.f32.mrf.mxu0  ;;  %2888 = vmatprep.subr.bf16.mxu0 %v3842_v1  ;;  %v4304_v12 = vld [vmem:[#allocation7] sm:$0x3f]  ;;  %v494_v5 = vsub.s32 1, %v4289_v25  ;;  %v3846_v25 = vld [vmem:[#allocation5 + $0x790] ss:$24 sps:$4 sm:$0xff]  }
 0x15c   :  { %4824 = vst [vmem:[#allocation31_spill] sm:$0xff] %v4297_v49  ;;  %v4299_v4 = vpop.f32.mrf.mxu1  ;;  %3390 = vmatprep.subr.bf16.mxu1 %v3842_v1  ;;  %2738 = vmatprep.mubr.bf16.mxu0 %v4057_v46  ;;  %4826 = vst [vmem:[#allocation33_spill] sm:$0xff] %v4304_v12  ;;  %v3848_v46 = vld [vmem:[#allocation5 + $0x794] ss:$24 sps:$4 sm:$0xff]  }
 0x15d   :  { %4825 = vst [vmem:[#allocation32_spill] sm:$0xff] %v4299_v4  ;;  %2851 = vmatprep.mubr.bf16.mxu1 %v4059_v47  ;;  %v4306_v31 = vpop.f32.mrf.mxu0  ;;  %v3843_v4 = vld [vmem:[#allocation5 + $0x7c0] ss:$24 sps:$4 sm:$0xff]   ;;  %v4316_v47 = vrot.slane %v4304_v12, %v490_v58 }
 0x15e   :  { %4827 = vst [vmem:[#allocation34_spill] sm:$0xff] %v4306_v31  ;;  %v4308_v32 = vpop.f32.mrf.mxu1  ;;  %2889 = vmatpush2.bf16.msra.mxu0 %v3840_v13 }
 0x15f   :  { %3406 = vmatpush2.bf16.msra.mxu1 %v3840_v13  ;;  %v4311_v49 = vpop.f32.mrf.mxu0  ;;  %2890 = vmatprep.subr.bf16.mxu0 %v3845_v14  ;;  %v4325_v13 = vrot.slane %v4304_v12, %v494_v5  ;;  %v1993_v58 = vadd.f32 %v4169_v56, %v4316_v47 }
 0x160   :  { %v4313_v1 = vpop.f32.mrf.mxu1  ;;  %3391 = vmatprep.subr.bf16.mxu1 %v3845_v14 }
 0x161   :  { %4828 = vst [vmem:[#allocation35_spill] sm:$0xff] %v4313_v1  ;;  %v4318_v50 = vpop.f32.mrf.mxu0  ;;  %2739 = vmatmul.mubr.bf16.gmra.mxu0 %v4065_v60 }
 0x162   :  { %v4320_v31 = vpop.f32.mrf.mxu1  ;;  %2852 = vmatmul.mubr.bf16.gmra.mxu1 %v4067_v61  ;;  %2891 = vmatpush2.bf16.msra.mxu0 %v3843_v4 }
 0x163   :  { %3407 = vmatpush2.bf16.msra.mxu1 %v3843_v4  ;;  %v4327_v1 = vpop.f32.mrf.mxu0  ;;  %2892 = vmatprep.subr.bf16.mxu0 %v3848_v46  ;;  %v1995_v4 = vadd.f32 %v4175_v53, %v4325_v13 }
 0x164   :  { %v4329_v14 = vpop.f32.mrf.mxu1  ;;  %3392 = vmatprep.subr.bf16.mxu1 %v3848_v46  ;;  %2894 = vmatprep.mubr.bf16.mxu0 %v4069_v10  ;;  %v2106_v46 = vadd.f32 %v4171_v57, %v1993_v58  ;;  %v1997_v10 = vadd.f32 %v4181_v8, %v4316_v47 }
 0x165   :  { %2934 = vmatprep.mubr.bf16.mxu1 %v4101_v7  ;;  %v4335_v60 = vpop.f32.mrf.mxu0  ;;  %v2108_v53 = vadd.f32 %v4177_v54, %v1995_v4 }
 0x166   :  { %v4337_v61 = vpop.f32.mrf.mxu1  ;;  %2893 = vmatpush2.bf16.msra.mxu0 %v3846_v25  ;;  %v2110_v8 = vadd.f32 %v4183_v9, %v1997_v10 }
 0x167   :  { %4829 = vst [vmem:[#allocation36_spill] sm:$0xff] %v4337_v61  ;;  %3408 = vmatpush2.bf16.msra.mxu1 %v3846_v25  ;;  %v4341_v5 = vpop.f32.mrf.mxu0  ;;  %v1999_v25 = vadd.f32 %v4185_v17, %v4325_v13 }
 0x168   :  { %v4343_v12 = vpop.f32.mrf.mxu1 }
 0x169   :  { %v2218_v56 = vpop.f32.mrf.mxu0  ;;  %2895 = vmatmul.mubr.bf16.vlgmr.msra.gmra.mxu0 %v4075_v22  ;;  %v2003_v22 = vadd.f32 %v4189_v28, %v4316_v47  ;;  %v2112_v17 = vadd.f32 %v4187_v11, %v1999_v25  ;;  %v2007_v28 = vadd.f32 %v4201_v38, %v4316_v47 }
 0x16a   :  { %v4348_v7 = vpop.f32.mrf.mxu1  ;;  %2935 = vmatmul.mubr.bf16.vlgmr.msra.gmra.mxu1 %v4107_v27  ;;  %v2219_v61 = vadd.f32 %v2218_v56, %v2106_v46  ;;  %2904 = vmatprep.mubr.bf16.mxu0 %v4077_v35  ;;  %v2005_v35 = vadd.f32 %v4195_v24, %v4325_v13  ;;  %v2009_v24 = vadd.f32 %v4205_v37, %v4325_v13 }
 0x16b   :  { %4830 = vst [vmem:[#allocation37_spill] sm:$0xff] %v4348_v7  ;;  %2944 = vmatprep.mubr.bf16.mxu1 %v4109_v42  ;;  %v2220_v57 = vpop.f32.mrf.mxu0  ;;  %v2116_v9 = vadd.f32 %v4191_v29, %v2003_v22 }
 0x16c   :  { %v4357_v58 = vpop.f32.mrf.mxu1  ;;  %2975 = vst [vmem:[#allocation8] sm:$0xff] %v2219_v61  ;;  %v2221_v27 = vadd.f32 %v2220_v57, %v2108_v53  ;;  %v2118_v11 = vadd.f32 %v4197_v30, %v2005_v35  ;;  %v2120_v53 = vadd.f32 %v4203_v45, %v2007_v28  ;;  %v2122_v37 = vadd.f32 %v4207_v48, %v2009_v24  ;;  %v4832_v28 = vld [vmem:[#allocation16_spill] sm:$0xff] }
 0x16d   :  { %v2222_v7 = vpop.f32.mrf.mxu0 }
 0x16e   :  { %v4362_v54 = vpop.f32.mrf.mxu1  ;;  %2976 = vst [vmem:[#allocation8 + $0x8] sm:$0xff] %v2221_v27  ;;  %v2223_v42 = vadd.f32 %v2222_v7, %v2110_v8 }
 0x16f   :  { %v2224_v4 = vpop.f32.mrf.mxu0 }
 0x170   :  { %v4367_v46 = vpop.f32.mrf.mxu1  ;;  %2981 = vst [vmem:[#allocation8 + $0x30] sm:$0xff] %v2223_v42  ;;  %v2225_v61 = vadd.f32 %v2224_v4, %v2112_v17 }
 0x171   :  { %v2228_v10 = vpop.f32.mrf.mxu0  ;;  %2905 = vmatmul.mubr.bf16.gmra.mxu0 %v4083_v55  ;;  %v2013_v55 = vadd.f32 %v4209_v62, %v4316_v47  ;;  %v2017_v62 = vadd.f32 %v4221_v23, %v4316_v47 }
 0x172   :  { %v4372_v56 = vpop.f32.mrf.mxu1  ;;  %2945 = vmatmul.mubr.bf16.gmra.mxu1 %v4115_v63  ;;  %2982 = vst [vmem:[#allocation8 + $0x38] sm:$0xff] %v2225_v61  ;;  %v2229_v7 = vadd.f32 %v2228_v10, %v2116_v9  ;;  %2914 = vmatprep.mubr.bf16.mxu0 %v4085_v0  ;;  %v2015_v0 = vadd.f32 %v4215_v44, %v4325_v13 }
 0x173   :  { %2954 = vmatprep.mubr.bf16.mxu1 %v4117_v19  ;;  %v2230_v29 = vpop.f32.mrf.mxu0  ;;  %v2126_v45 = vadd.f32 %v4211_v6, %v2013_v55  ;;  %v2019_v44 = vadd.f32 %v4225_v59, %v4325_v13  ;;  %v2130_v42 = vadd.f32 %v4223_v34, %v2017_v62  ;;  %v4831_v59 = vld [vmem:[#allocation14_spill] sm:$0xff]  ;;  %v4835_v55 = vld [vmem:[#allocation13_spill] sm:$0xff] }
 0x174   :  { %v4381_v38 = vpop.f32.mrf.mxu1  ;;  %2987 = vst [vmem:[#allocation8 + $0x60] sm:$0xff] %v2229_v7  ;;  %v2231_v63 = vadd.f32 %v2230_v29, %v2118_v11  ;;  %v2128_v48 = vadd.f32 %v4217_v16, %v2015_v0  ;;  %v4833_v11 = vld [vmem:[#allocation15_spill] sm:$0xff] }
 0x175   :  { %v2232_v30 = vpop.f32.mrf.mxu0  ;;  %v2132_v9 = vadd.f32 %v4831_v59, %v2019_v44 }
 0x176   :  { %v4386_v25 = vpop.f32.mrf.mxu1  ;;  %2988 = vst [vmem:[#allocation8 + $0x68] sm:$0xff] %v2231_v63  ;;  %v2233_v19 = vadd.f32 %v2232_v30, %v2120_v53  ;;  %v4834_v53 = vld [vmem:[#allocation12_spill] sm:$0xff]  ;;  %v4836_v63 = vld [vmem:[#allocation17_spill] sm:$0xff] }
 0x177   :  { %v2234_v57 = vpop.f32.mrf.mxu0 }
 0x178   :  { %v4391_v8 = vpop.f32.mrf.mxu1  ;;  %2993 = vst [vmem:[#allocation8 + $0x90] sm:$0xff] %v2233_v19  ;;  %v2235_v22 = vadd.f32 %v2234_v57, %v2122_v37  ;;  %v2029_v37 = vadd.f32 %v4245_v15, %v4325_v13 }
 0x179   :  { %v2238_v27 = vpop.f32.mrf.mxu0  ;;  %2915 = vmatmul.mubr.bf16.gmra.mxu0 %v4091_v20  ;;  %v2023_v20 = vadd.f32 %v4229_v52, %v4316_v47  ;;  %v2027_v52 = vadd.f32 %v4241_v21, %v4316_v47 }
 0x17a   :  { %v4396_v17 = vpop.f32.mrf.mxu1  ;;  %2955 = vmatmul.mubr.bf16.gmra.mxu1 %v4123_v39  ;;  %2994 = vst [vmem:[#allocation8 + $0x98] sm:$0xff] %v2235_v22  ;;  %v2239_v35 = vadd.f32 %v2238_v27, %v2126_v45  ;;  %2924 = vmatprep.mubr.bf16.mxu0 %v4093_v33  ;;  %v2025_v33 = vadd.f32 %v4832_v28, %v4325_v13  ;;  %v4840_v28 = vld [vmem:[#allocation21_spill] sm:$0xff] }
 0x17b   :  { %2964 = vmatprep.mubr.bf16.mxu1 %v4125_v3  ;;  %v2240_v6 = vpop.f32.mrf.mxu0  ;;  %v2136_v34 = vadd.f32 %v4833_v11, %v2023_v20  ;;  %v2140_v21 = vadd.f32 %v4243_v51, %v2027_v52  ;;  %v2033_v45 = vadd.f32 %v4249_v18, %v4316_v47  ;;  %v2037_v18 = vadd.f32 %v4261_v36, %v4316_v47 }
 0x17c   :  { %v4405_v23 = vpop.f32.mrf.mxu1  ;;  %2999 = vst [vmem:[#allocation8 + $0xc0] sm:$0xff] %v2239_v35  ;;  %v2241_v39 = vadd.f32 %v2240_v6, %v2128_v48  ;;  %v2138_v30 = vadd.f32 %v4836_v63, %v2025_v33  ;;  %v4837_v48 = vld [vmem:[#allocation18_spill] sm:$0xff]  ;;  %v4838_v35 = vld [vmem:[#allocation20_spill] sm:$0xff] }
 0x17d   :  { %v2242_v16 = vpop.f32.mrf.mxu0  ;;  %v2142_v44 = vadd.f32 %v4837_v48, %v2029_v37  ;;  %v2035_v15 = vadd.f32 %v4838_v35, %v4325_v13  ;;  %v2150_v52 = vadd.f32 %v4263_v2, %v2037_v18  ;;  %v4842_v63 = vld [vmem:[#allocation22_spill] sm:$0xff]  ;;  %v4843_v37 = vld [vmem:[#allocation25_spill] sm:$0xff]  ;;  %v4846_v18 = vld [vmem:[#allocation27_spill] sm:$0xff] }
 0x17e   :  { %v4410_v4 = vpop.f32.mrf.mxu1  ;;  %3000 = vst [vmem:[#allocation8 + $0xc8] sm:$0xff] %v2241_v39  ;;  %v2243_v3 = vadd.f32 %v2242_v16, %v2130_v42  ;;  %v4839_v39 = vld [vmem:[#allocation19_spill] sm:$0xff]  ;;  %v4845_v35 = vld [vmem:[#allocation26_spill] sm:$0xff] }
 0x17f   :  { %v2244_v61 = vpop.f32.mrf.mxu0  ;;  %v2146_v51 = vadd.f32 %v4839_v39, %v2033_v45  ;;  %v2148_v33 = vadd.f32 %v4840_v28, %v2035_v15  ;;  %v4844_v45 = vld [vmem:[#allocation24_spill] sm:$0xff] }
 0x180   :  { %v4415_v10 = vpop.f32.mrf.mxu1  ;;  %3005 = vst [vmem:[#allocation8 + $0xf0] sm:$0xff] %v2243_v3  ;;  %v2245_v24 = vadd.f32 %v2244_v61, %v2132_v9  ;;  %v2039_v3 = vadd.f32 %v4265_v41, %v4325_v13  ;;  %v2045_v41 = vadd.f32 %v4843_v37, %v4325_v13 }
 0x181   :  { %v2248_v7 = vpop.f32.mrf.mxu0  ;;  %2925 = vmatmul.mubr.bf16.gmra.mxu0 %v4834_v53 }
 0x182   :  { %v4420_v29 = vpop.f32.mrf.mxu1  ;;  %2965 = vmatmul.mubr.bf16.gmra.mxu1 %v4835_v55  ;;  %3006 = vst [vmem:[#allocation8 + $0xf8] sm:$0xff] %v2245_v24  ;;  %v2249_v0 = vadd.f32 %v2248_v7, %v2136_v34  ;;  %v4841_v24 = vld [vmem:[#allocation23_spill] sm:$0xff]  ;;  %v2158_v15 = vadd.f32 %v4845_v35, %v2045_v41  ;;  %v2063_v35 = vadd.f32 %v4318_v50, %v4316_v47 }
 0x183   :  { %v2250_v19 = vpop.f32.mrf.mxu0  ;;  %v2043_v36 = vadd.f32 %v4841_v24, %v4316_v47  ;;  %v2067_v50 = vadd.f32 %v4335_v60, %v4316_v47 }
 0x184   :  { %v4427_v57 = vpop.f32.mrf.mxu1  ;;  %3011 = vst [vmem:[#allocation8 + $0x120] sm:$0xff] %v2249_v0  ;;  %v2251_v62 = vadd.f32 %v2250_v19, %v2138_v30  ;;  %v2152_v30 = vadd.f32 %v4842_v63, %v2039_v3  ;;  %v4847_v3 = vld [vmem:[#allocation28_spill] sm:$0xff]  ;;  %v4850_v63 = vld [vmem:[#allocation34_spill] sm:$0xff] }
 0x185   :  { %v2252_v22 = vpop.f32.mrf.mxu0  ;;  %v2156_v2 = vadd.f32 %v4844_v45, %v2043_v36  ;;  %v2059_v45 = vadd.f32 %v4311_v49, %v4325_v13  ;;  %v2065_v49 = vadd.f32 %v4327_v1, %v4325_v13  ;;  %v2069_v1 = vadd.f32 %v4341_v5, %v4325_v13 }
 0x186   :  { %v4432_v27 = vpop.f32.mrf.mxu1  ;;  %3012 = vst [vmem:[#allocation8 + $0x128] sm:$0xff] %v2251_v62  ;;  %v2253_v6 = vadd.f32 %v2252_v22, %v2140_v21  ;;  %v2047_v62 = vadd.f32 %v4281_v26, %v4316_v47  ;;  %v2053_v26 = vadd.f32 %v4291_v43, %v4316_v47  ;;  %v2057_v43 = vadd.f32 %v4850_v63, %v4316_v47  ;;  %v4854_v47 = vld [vmem:[#allocation36_spill] sm:$0xff]  ;;  %v4855_v63 = vld [vmem:[#allocation33_spill] sm:$0xff] }
 0x187   :  { %v2254_v42 = vpop.f32.mrf.mxu0  ;;  %v2180_v60 = vadd.f32 %v4854_v47, %v2067_v50 }
 0x188   :  { %v4437_v20 = vpop.f32.mrf.mxu1  ;;  %3017 = vst [vmem:[#allocation8 + $0x150] sm:$0xff] %v2253_v6  ;;  %v2255_v16 = vadd.f32 %v2254_v42, %v2142_v44  ;;  %v2049_v6 = vadd.f32 %v4285_v40, %v4325_v13 }
 0x189   :  { %v2258_v59 = vpop.f32.mrf.mxu0 }
 0x18a   :  { %v4442_v9 = vpop.f32.mrf.mxu1  ;;  %3018 = vst [vmem:[#allocation8 + $0x158] sm:$0xff] %v2255_v16  ;;  %v2259_v61 = vadd.f32 %v2258_v59, %v2146_v51  ;;  %v2160_v16 = vadd.f32 %v4846_v18, %v2047_v62 }
 0x18b   :  { %v2260_v11 = vpop.f32.mrf.mxu0 }
 0x18c   :  { %v4447_v34 = vpop.f32.mrf.mxu1  ;;  %3023 = vst [vmem:[#allocation8 + $0x180] sm:$0xff] %v2259_v61  ;;  %v2261_v7 = vadd.f32 %v2260_v11, %v2148_v33  ;;  %v2162_v61 = vadd.f32 %v4847_v3, %v2049_v6  ;;  %v4848_v11 = vld [vmem:[#allocation31_spill] sm:$0xff] }
 0x18d   :  { %v2262_v53 = vpop.f32.mrf.mxu0  ;;  %v2055_v40 = vadd.f32 %v4848_v11, %v4325_v13 }
 0x18e   :  { %v4452_v55 = vpop.f32.mrf.mxu1  ;;  %3024 = vst [vmem:[#allocation8 + $0x188] sm:$0xff] %v2261_v7  ;;  %v2263_v0 = vadd.f32 %v2262_v53, %v2150_v52  ;;  %v4849_v7 = vld [vmem:[#allocation30_spill] sm:$0xff] }
 0x18f   :  { %v2264_v19 = vpop.f32.mrf.mxu0  ;;  %v2166_v53 = vadd.f32 %v4849_v7, %v2053_v26 }
 0x190   :  { %v4457_v21 = vpop.f32.mrf.mxu1  ;;  %3029 = vst [vmem:[#allocation8 + $0x1b0] sm:$0xff] %v2263_v0  ;;  %v2265_v22 = vadd.f32 %v2264_v19, %v2152_v30  ;;  %v4851_v0 = vld [vmem:[#allocation32_spill] sm:$0xff] }
 0x191   :  { %v2268_v48 = vpop.f32.mrf.mxu0  ;;  %v2168_v19 = vadd.f32 %v4851_v0, %v2055_v40 }
 0x192   :  { %v4462_v44 = vpop.f32.mrf.mxu1  ;;  %3030 = vst [vmem:[#allocation8 + $0x1b8] sm:$0xff] %v2265_v22  ;;  %v2269_v42 = vadd.f32 %v2268_v48, %v2156_v2  ;;  %v2170_v48 = vadd.f32 %v4308_v32, %v2057_v43  ;;  %v2176_v32 = vadd.f32 %v4320_v31, %v2063_v35 }
 0x193   :  { %v2270_v39 = vpop.f32.mrf.mxu0 }
 0x194   :  { %v4467_v51 = vpop.f32.mrf.mxu1  ;;  %3035 = vst [vmem:[#allocation8 + $0x1e0] sm:$0xff] %v2269_v42  ;;  %v2271_v59 = vadd.f32 %v2270_v39, %v2158_v15  ;;  %v4852_v39 = vld [vmem:[#allocation35_spill] sm:$0xff] }
 0x195   :  { %v2272_v28 = vpop.f32.mrf.mxu0  ;;  %v2172_v18 = vadd.f32 %v4852_v39, %v2059_v45 }
 0x196   :  { %v4472_v33 = vpop.f32.mrf.mxu1  ;;  %3036 = vst [vmem:[#allocation8 + $0x1e8] sm:$0xff] %v2271_v59  ;;  %v2273_v52 = vadd.f32 %v2272_v28, %v2160_v16  ;;  %v4853_v28 = vld [vmem:[#allocation29_spill] sm:$0xff] }
 0x197   :  { %v2274_v24 = vpop.f32.mrf.mxu0  ;;  %v498_v3 = vsub.s32 2, %v4853_v28 }
 0x198   :  { %v4477_v36 = vpop.f32.mrf.mxu1  ;;  %3041 = vst [vmem:[#allocation8 + $0x210] sm:$0xff] %v2273_v52  ;;  %v2275_v30 = vadd.f32 %v2274_v24, %v2162_v61  ;;  %v2178_v52 = vadd.f32 %v4329_v14, %v2065_v49  ;;  %v502_v24 = vsub.s32 3, %v4853_v28  ;;  %v2182_v14 = vadd.f32 %v4343_v12, %v2069_v1 }
 0x199   :  { %v2278_v37 = vpop.f32.mrf.mxu0  ;;  %v4513_v43 = vrot.slane %v4855_v63, %v498_v3 }
 0x19a   :  { %v4482_v41 = vpop.f32.mrf.mxu1  ;;  %3042 = vst [vmem:[#allocation8 + $0x218] sm:$0xff] %v2275_v30  ;;  %v2279_v2 = vadd.f32 %v2278_v37, %v2166_v53  ;;  %v4519_v13 = vrot.slane %v4855_v63, %v502_v24 }
 0x19b   :  { %v2280_v62 = vpop.f32.mrf.mxu0  ;;  %v2336_v49 = vadd.f32 %v4362_v54, %v4513_v43 }
 0x19c   :  { %v4487_v22 = vpop.f32.mrf.mxu1  ;;  %3047 = vst [vmem:[#allocation8 + $0x240] sm:$0xff] %v2279_v2  ;;  %v2281_v15 = vadd.f32 %v2280_v62, %v2168_v19  ;;  %v4856_v2 = vld [vmem:[#allocation37_spill] sm:$0xff]  ;;  %v2338_v3 = vadd.f32 %v4367_v46, %v4519_v13  ;;  %v2344_v47 = vadd.f32 %v4381_v38, %v4519_v13 }
 0x19d   :  { %v2282_v6 = vpop.f32.mrf.mxu0  ;;  %v2332_v62 = vadd.f32 %v4856_v2, %v4513_v43 }
 0x19e   :  { %v4492_v42 = vpop.f32.mrf.mxu1  ;;  %3048 = vst [vmem:[#allocation8 + $0x248] sm:$0xff] %v2281_v15  ;;  %v2283_v16 = vadd.f32 %v2282_v6, %v2170_v48  ;;  %v2334_v6 = vadd.f32 %v4357_v58, %v4519_v13  ;;  %v2342_v58 = vadd.f32 %v4372_v56, %v4513_v43 }
 0x19f   :  { %v2284_v26 = vpop.f32.mrf.mxu0 }
 0x1a0   :  { %v4497_v59 = vpop.f32.mrf.mxu1  ;;  %3053 = vst [vmem:[#allocation8 + $0x270] sm:$0xff] %v2283_v16  ;;  %v2285_v61 = vadd.f32 %v2284_v26, %v2172_v18 }
 0x1a1   :  { %v2288_v11 = vpop.f32.mrf.mxu0 }
 0x1a2   :  { %v4503_v40 = vpop.f32.mrf.mxu1  ;;  %3054 = vst [vmem:[#allocation8 + $0x278] sm:$0xff] %v2285_v61  ;;  %v2289_v7 = vadd.f32 %v2288_v11, %v2176_v32 }
 0x1a3   :  { %v2290_v31 = vpop.f32.mrf.mxu0 }
 0x1a4   :  { %v4509_v53 = vpop.f32.mrf.mxu1  ;;  %3059 = vst [vmem:[#allocation8 + $0x2a0] sm:$0xff] %v2289_v7  ;;  %v2291_v30 = vadd.f32 %v2290_v31, %v2178_v52 }
 0x1a5   :  { %v2292_v37 = vpop.f32.mrf.mxu0 }
 0x1a6   :  { %v4515_v0 = vpop.f32.mrf.mxu1  ;;  %3060 = vst [vmem:[#allocation8 + $0x2a8] sm:$0xff] %v2291_v30  ;;  %v2293_v5 = vadd.f32 %v2292_v37, %v2180_v60 }
 0x1a7   :  { %v2294_v19 = vpop.f32.mrf.mxu0 }
 0x1a8   :  { %v4521_v45 = vpop.f32.mrf.mxu1  ;;  %3065 = vst [vmem:[#allocation8 + $0x2d0] sm:$0xff] %v2293_v5  ;;  %v2295_v48 = vadd.f32 %v2294_v19, %v2182_v14  ;;  %v2346_v14 = vadd.f32 %v4386_v25, %v4513_v43 }
 0x1a9   :  { %v2444_v35 = vpop.f32.mrf.mxu0 }
 0x1aa   :  { %v2557_v15 = vpop.f32.mrf.mxu1  ;;  %3066 = vst [vmem:[#allocation8 + $0x2d8] sm:$0xff] %v2295_v48  ;;  %v2445_v12 = vadd.f32 %v2444_v35, %v2332_v62  ;;  %v2348_v62 = vadd.f32 %v4391_v8, %v4519_v13 }
 0x1ab   :  { %v2446_v39 = vpop.f32.mrf.mxu0 }
 0x1ac   :  { %v2559_v18 = vpop.f32.mrf.mxu1  ;;  %v2558_v16 = vadd.f32 %v2557_v15, %v2445_v12  ;;  %v2447_v26 = vadd.f32 %v2446_v39, %v2334_v6  ;;  %v2352_v6 = vadd.f32 %v4396_v17, %v4513_v43 }
 0x1ad   :  { %v2448_v32 = vpop.f32.mrf.mxu0 }
 0x1ae   :  { %v2561_v50 = vpop.f32.mrf.mxu1  ;;  %2977 = vst [vmem:[#allocation8 + $0x10] sm:$0xff] %v2558_v16  ;;  %v2560_v61 = vadd.f32 %v2559_v18, %v2447_v26  ;;  %v2449_v11 = vadd.f32 %v2448_v32, %v2336_v49  ;;  %v2354_v49 = vadd.f32 %v4405_v23, %v4519_v13 }
 0x1af   :  { %v2450_v52 = vpop.f32.mrf.mxu0 }
 0x1b0   :  { %v2563_v1 = vpop.f32.mrf.mxu1  ;;  %2978 = vst [vmem:[#allocation8 + $0x18] sm:$0xff] %v2560_v61  ;;  %v2562_v24 = vadd.f32 %v2561_v50, %v2449_v11  ;;  %v2451_v7 = vadd.f32 %v2450_v52, %v2338_v3  ;;  %v2356_v50 = vadd.f32 %v4410_v4, %v4513_v43  ;;  %v2358_v52 = vadd.f32 %v4415_v10, %v4519_v13 }
 0x1b1   :  { %v2454_v31 = vpop.f32.mrf.mxu0 }
 0x1b2   :  { %v2567_v54 = vpop.f32.mrf.mxu1  ;;  %2983 = vst [vmem:[#allocation8 + $0x40] sm:$0xff] %v2562_v24  ;;  %v2564_v60 = vadd.f32 %v2563_v1, %v2451_v7  ;;  %v2455_v30 = vadd.f32 %v2454_v31, %v2342_v58  ;;  %v2362_v7 = vadd.f32 %v4420_v29, %v4513_v43 }
 0x1b3   :  { %v2456_v46 = vpop.f32.mrf.mxu0 }
 0x1b4   :  { %v2569_v37 = vpop.f32.mrf.mxu1  ;;  %2984 = vst [vmem:[#allocation8 + $0x48] sm:$0xff] %v2564_v60  ;;  %v2568_v5 = vadd.f32 %v2567_v54, %v2455_v30  ;;  %v2457_v19 = vadd.f32 %v2456_v46, %v2344_v47  ;;  %v2364_v60 = vadd.f32 %v4427_v57, %v4519_v13 }
 0x1b5   :  { %v2458_v56 = vpop.f32.mrf.mxu0 }
 0x1b6   :  { %v2571_v2 = vpop.f32.mrf.mxu1  ;;  %2989 = vst [vmem:[#allocation8 + $0x70] sm:$0xff] %v2568_v5  ;;  %v2570_v48 = vadd.f32 %v2569_v37, %v2457_v19  ;;  %v2459_v35 = vadd.f32 %v2458_v56, %v2346_v14  ;;  %v2366_v14 = vadd.f32 %v4432_v27, %v4513_v43 }
 0x1b7   :  { %v2460_v38 = vpop.f32.mrf.mxu0 }
 0x1b8   :  { %v2573_v15 = vpop.f32.mrf.mxu1  ;;  %2990 = vst [vmem:[#allocation8 + $0x78] sm:$0xff] %v2570_v48  ;;  %v2572_v12 = vadd.f32 %v2571_v2, %v2459_v35  ;;  %v2461_v39 = vadd.f32 %v2460_v38, %v2348_v62  ;;  %v2368_v2 = vadd.f32 %v4437_v20, %v4519_v13  ;;  %v2372_v38 = vadd.f32 %v4442_v9, %v4513_v43 }
 0x1b9   :  { %v2464_v25 = vpop.f32.mrf.mxu0 }
 0x1ba   :  { %v2577_v18 = vpop.f32.mrf.mxu1  ;;  %2995 = vst [vmem:[#allocation8 + $0xa0] sm:$0xff] %v2572_v12  ;;  %v2574_v16 = vadd.f32 %v2573_v15, %v2461_v39  ;;  %v2465_v26 = vadd.f32 %v2464_v25, %v2352_v6  ;;  %v2374_v39 = vadd.f32 %v4447_v34, %v4519_v13 }
 0x1bb   :  { %v2466_v8 = vpop.f32.mrf.mxu0 }
 0x1bc   :  { %v2579_v32 = vpop.f32.mrf.mxu1  ;;  %2996 = vst [vmem:[#allocation8 + $0xa8] sm:$0xff] %v2574_v16  ;;  %v2578_v3 = vadd.f32 %v2577_v18, %v2465_v26  ;;  %v2467_v61 = vadd.f32 %v2466_v8, %v2354_v49  ;;  %v2376_v16 = vadd.f32 %v4452_v55, %v4513_v43 }
 0x1bd   :  { %v2468_v17 = vpop.f32.mrf.mxu0 }
 0x1be   :  { %v2581_v11 = vpop.f32.mrf.mxu1  ;;  %3001 = vst [vmem:[#allocation8 + $0xd0] sm:$0xff] %v2578_v3  ;;  %v2580_v1 = vadd.f32 %v2579_v32, %v2467_v61  ;;  %v2469_v58 = vadd.f32 %v2468_v17, %v2356_v50  ;;  %v2378_v50 = vadd.f32 %v4457_v21, %v4519_v13 }
 0x1bf   :  { %v2470_v23 = vpop.f32.mrf.mxu0 }
 0x1c0   :  { %v2583_v24 = vpop.f32.mrf.mxu1  ;;  %3002 = vst [vmem:[#allocation8 + $0xd8] sm:$0xff] %v2580_v1  ;;  %v2582_v31 = vadd.f32 %v2581_v11, %v2469_v58  ;;  %v2471_v54 = vadd.f32 %v2470_v23, %v2358_v52  ;;  %v2382_v11 = vadd.f32 %v4462_v44, %v4513_v43  ;;  %v2384_v23 = vadd.f32 %v4467_v51, %v4519_v13 }
 0x1c1   :  { %v2474_v4 = vpop.f32.mrf.mxu0 }
 0x1c2   :  { %v2587_v47 = vpop.f32.mrf.mxu1  ;;  %3007 = vst [vmem:[#allocation8 + $0x100] sm:$0xff] %v2582_v31  ;;  %v2584_v30 = vadd.f32 %v2583_v24, %v2471_v54  ;;  %v2475_v46 = vadd.f32 %v2474_v4, %v2362_v7  ;;  %v2386_v54 = vadd.f32 %v4472_v33, %v4513_v43 }
 0x1c3   :  { %v2476_v10 = vpop.f32.mrf.mxu0 }
 0x1c4   :  { %v2589_v37 = vpop.f32.mrf.mxu1  ;;  %3008 = vst [vmem:[#allocation8 + $0x108] sm:$0xff] %v2584_v30  ;;  %v2588_v5 = vadd.f32 %v2587_v47, %v2475_v46  ;;  %v2477_v19 = vadd.f32 %v2476_v10, %v2364_v60  ;;  %v2388_v30 = vadd.f32 %v4477_v36, %v4519_v13 }
 0x1c5   :  { %v2478_v29 = vpop.f32.mrf.mxu0 }
 0x1c6   :  { %v2591_v56 = vpop.f32.mrf.mxu1  ;;  %3013 = vst [vmem:[#allocation8 + $0x130] sm:$0xff] %v2588_v5  ;;  %v2590_v62 = vadd.f32 %v2589_v37, %v2477_v19  ;;  %v2479_v48 = vadd.f32 %v2478_v29, %v2366_v14  ;;  %v2392_v14 = vadd.f32 %v4482_v41, %v4513_v43 }
 0x1c7   :  { %v2480_v57 = vpop.f32.mrf.mxu0 }
 0x1c8   :  { %v2593_v35 = vpop.f32.mrf.mxu1  ;;  %3014 = vst [vmem:[#allocation8 + $0x138] sm:$0xff] %v2590_v62  ;;  %v2592_v15 = vadd.f32 %v2591_v56, %v2479_v48  ;;  %v2481_v6 = vadd.f32 %v2480_v57, %v2368_v2  ;;  %v2394_v56 = vadd.f32 %v4487_v22, %v4519_v13  ;;  %v2396_v57 = vadd.f32 %v4492_v42, %v4513_v43 }
 0x1c9   :  { %v2484_v27 = vpop.f32.mrf.mxu0 }
 0x1ca   :  { %v2597_v12 = vpop.f32.mrf.mxu1  ;;  %3019 = vst [vmem:[#allocation8 + $0x160] sm:$0xff] %v2592_v15  ;;  %v2594_v25 = vadd.f32 %v2593_v35, %v2481_v6  ;;  %v2485_v18 = vadd.f32 %v2484_v27, %v2372_v38  ;;  %v2398_v6 = vadd.f32 %v4497_v59, %v4519_v13 }
 0x1cb   :  { %v2486_v20 = vpop.f32.mrf.mxu0 }
 0x1cc   :  { %v2599_v49 = vpop.f32.mrf.mxu1  ;;  %3020 = vst [vmem:[#allocation8 + $0x168] sm:$0xff] %v2594_v25  ;;  %v2598_v26 = vadd.f32 %v2597_v12, %v2485_v18  ;;  %v2487_v8 = vadd.f32 %v2486_v20, %v2374_v39  ;;  %v2402_v25 = vadd.f32 %v4503_v40, %v4513_v43 }
 0x1cd   :  { %v2488_v9 = vpop.f32.mrf.mxu0 }
 0x1ce   :  { %v2601_v32 = vpop.f32.mrf.mxu1  ;;  %3025 = vst [vmem:[#allocation8 + $0x190] sm:$0xff] %v2598_v26  ;;  %v2600_v3 = vadd.f32 %v2599_v49, %v2487_v8  ;;  %v2489_v61 = vadd.f32 %v2488_v9, %v2376_v16  ;;  %v2404_v16 = vadd.f32 %v4509_v53, %v4519_v13 }
 0x1cf   :  { %v2490_v34 = vpop.f32.mrf.mxu0 }
 0x1d0   :  { %v2603_v17 = vpop.f32.mrf.mxu1  ;;  %3026 = vst [vmem:[#allocation8 + $0x198] sm:$0xff] %v2600_v3  ;;  %v2602_v52 = vadd.f32 %v2601_v32, %v2489_v61  ;;  %v2491_v1 = vadd.f32 %v2490_v34, %v2378_v50  ;;  %v2406_v32 = vadd.f32 %v4515_v0, %v4513_v43  ;;  %v2408_v34 = vadd.f32 %v4521_v45, %v4519_v13 }
 0x1d1   :  { %v2494_v55 = vpop.f32.mrf.mxu0 }
 0x1d2   :  { %v2607_v58 = vpop.f32.mrf.mxu1  ;;  %3031 = vst [vmem:[#allocation8 + $0x1c0] sm:$0xff] %v2602_v52  ;;  %v2604_v24 = vadd.f32 %v2603_v17, %v2491_v1  ;;  %v2495_v7 = vadd.f32 %v2494_v55, %v2382_v11 }
 0x1d3   :  { %v2496_v21 = vpop.f32.mrf.mxu0 }
 0x1d4   :  { %v2609_v31 = vpop.f32.mrf.mxu1  ;;  %3032 = vst [vmem:[#allocation8 + $0x1c8] sm:$0xff] %v2604_v24  ;;  %v2608_v4 = vadd.f32 %v2607_v58, %v2495_v7  ;;  %v2497_v47 = vadd.f32 %v2496_v21, %v2384_v23 }
 0x1d5   :  { %v2498_v44 = vpop.f32.mrf.mxu0 }
 0x1d6   :  { %v2611_v60 = vpop.f32.mrf.mxu1  ;;  %3037 = vst [vmem:[#allocation8 + $0x1f0] sm:$0xff] %v2608_v4  ;;  %v2610_v46 = vadd.f32 %v2609_v31, %v2497_v47  ;;  %v2499_v10 = vadd.f32 %v2498_v44, %v2386_v54 }
 0x1d7   :  { %v2500_v51 = vpop.f32.mrf.mxu0 }
 0x1d8   :  { %v2613_v37 = vpop.f32.mrf.mxu1  ;;  %3038 = vst [vmem:[#allocation8 + $0x1f8] sm:$0xff] %v2610_v46  ;;  %v2612_v5 = vadd.f32 %v2611_v60, %v2499_v10  ;;  %v2501_v19 = vadd.f32 %v2500_v51, %v2388_v30 }
 0x1d9   :  { %v2504_v33 = vpop.f32.mrf.mxu0 }
 0x1da   :  { %v2617_v29 = vpop.f32.mrf.mxu1  ;;  %3043 = vst [vmem:[#allocation8 + $0x220] sm:$0xff] %v2612_v5  ;;  %v2614_v2 = vadd.f32 %v2613_v37, %v2501_v19  ;;  %v2505_v62 = vadd.f32 %v2504_v33, %v2392_v14 }
 0x1db   :  { %v2506_v36 = vpop.f32.mrf.mxu0 }
 0x1dc   :  { %v2619_v48 = vpop.f32.mrf.mxu1  ;;  %3044 = vst [vmem:[#allocation8 + $0x228] sm:$0xff] %v2614_v2  ;;  %v2618_v35 = vadd.f32 %v2617_v29, %v2505_v62  ;;  %v2507_v38 = vadd.f32 %v2506_v36, %v2394_v56 }
 0x1dd   :  { %v2508_v41 = vpop.f32.mrf.mxu0 }
 0x1de   :  { %v2621_v15 = vpop.f32.mrf.mxu1  ;;  %3049 = vst [vmem:[#allocation8 + $0x250] sm:$0xff] %v2618_v35  ;;  %v2620_v27 = vadd.f32 %v2619_v48, %v2507_v38  ;;  %v2509_v12 = vadd.f32 %v2508_v41, %v2396_v57 }
 0x1df   :  { %v2510_v22 = vpop.f32.mrf.mxu0 }
 0x1e0   :  { %v2623_v39 = vpop.f32.mrf.mxu1  ;;  %3050 = vst [vmem:[#allocation8 + $0x258] sm:$0xff] %v2620_v27  ;;  %v2622_v18 = vadd.f32 %v2621_v15, %v2509_v12  ;;  %v2511_v20 = vadd.f32 %v2510_v22, %v2398_v6 }
 0x1e1   :  { %v2514_v42 = vpop.f32.mrf.mxu0 }
 0x1e2   :  { %v2627_v49 = vpop.f32.mrf.mxu1  ;;  %3055 = vst [vmem:[#allocation8 + $0x280] sm:$0xff] %v2622_v18  ;;  %v2624_v26 = vadd.f32 %v2623_v39, %v2511_v20  ;;  %v2515_v8 = vadd.f32 %v2514_v42, %v2402_v25 }
 0x1e3   :  { %v2516_v59 = vpop.f32.mrf.mxu0 }
 0x1e4   :  { %v2629_v9 = vpop.f32.mrf.mxu1  ;;  %3056 = vst [vmem:[#allocation8 + $0x288] sm:$0xff] %v2624_v26  ;;  %v2628_v50 = vadd.f32 %v2627_v49, %v2515_v8  ;;  %v2517_v3 = vadd.f32 %v2516_v59, %v2404_v16 }
 0x1e5   :  { %v2518_v40 = vpop.f32.mrf.mxu0 }
 0x1e6   :  { %v2631_v61 = vpop.f32.mrf.mxu1  ;;  %3061 = vst [vmem:[#allocation8 + $0x2b0] sm:$0xff] %v2628_v50  ;;  %v2630_v17 = vadd.f32 %v2629_v9, %v2517_v3  ;;  %v2519_v11 = vadd.f32 %v2518_v40, %v2406_v32  ;;  %v506_v40 = vsub.s32 4, %v4853_v28 }
 0x1e7   :  { %v2520_v53 = vpop.f32.mrf.mxu0 }
 0x1e8   :  { %v2633_v52 = vpop.f32.mrf.mxu1  ;;  %3062 = vst [vmem:[#allocation8 + $0x2b8] sm:$0xff] %v2630_v17  ;;  %v2632_v1 = vadd.f32 %v2631_v61, %v2519_v11  ;;  %v2521_v55 = vadd.f32 %v2520_v53, %v2408_v34  ;;  %v510_v61 = vsub.s32 5, %v4853_v28 }
 0x1e9   :  { %v4587_v58 = vpop.f32.mrf.mxu0 }
 0x1ea   :  { %v4589_v23 = vpop.f32.mrf.mxu1  ;;  %3067 = vst [vmem:[#allocation8 + $0x2e0] sm:$0xff] %v2632_v1  ;;  %v2634_v43 = vadd.f32 %v2633_v52, %v2521_v55  ;;  %v4682_v52 = vrot.slane %v4855_v63, %v506_v40  ;;  %v4685_v1 = vrot.slane %v4855_v63, %v510_v61 }
 0x1eb   :  { %v4591_v0 = vpop.f32.mrf.mxu0 }
 0x1ec   :  { %v4593_v24 = vpop.f32.mrf.mxu1  ;;  %3068 = vst [vmem:[#allocation8 + $0x2e8] sm:$0xff] %v2634_v43  ;;  %v2673_v40 = vadd.f32 %v4591_v0, %v4685_v1 }
 0x1ed   :  { %v4595_v13 = vpop.f32.mrf.mxu0 }
 0x1ee   :  { %v4597_v45 = vpop.f32.mrf.mxu1  ;;  %v2786_v0 = vadd.f32 %v4593_v24, %v2673_v40 }
 0x1ef   :  { %v4599_v7 = vpop.f32.mrf.mxu0 }
 0x1f0   :  { %v4601_v21 = vpop.f32.mrf.mxu1 }
 0x1f1   :  { %v4603_v31 = vpop.f32.mrf.mxu0 }
 0x1f2   :  { %v4605_v54 = vpop.f32.mrf.mxu1 }
 0x1f3   :  { %v4607_v4 = vpop.f32.mrf.mxu0 }
 0x1f4   :  { %v4609_v47 = vpop.f32.mrf.mxu1 }
 0x1f5   :  { %v4611_v44 = vpop.f32.mrf.mxu0 }
 0x1f6   :  { %v4613_v60 = vpop.f32.mrf.mxu1 }
 0x1f7   :  { %v4615_v30 = vpop.f32.mrf.mxu0 }
 0x1f8   :  { %v4617_v46 = vpop.f32.mrf.mxu1 }
 0x1f9   :  { %v4619_v10 = vpop.f32.mrf.mxu0 }
 0x1fa   :  { %v4621_v51 = vpop.f32.mrf.mxu1 }
 0x1fb   :  { %v4623_v37 = vpop.f32.mrf.mxu0 }
 0x1fc   :  { %v4625_v14 = vpop.f32.mrf.mxu1 }
 0x1fd   :  { %v4627_v5 = vpop.f32.mrf.mxu0 }
 0x1fe   :  { %v4629_v19 = vpop.f32.mrf.mxu1 }
 0x1ff   :  { %v4631_v33 = vpop.f32.mrf.mxu0 }
 0x200   :  { %v4633_v29 = vpop.f32.mrf.mxu1 }
 0x201   :  { %v4635_v56 = vpop.f32.mrf.mxu0 }
 0x202   :  { %v4637_v2 = vpop.f32.mrf.mxu1 }
 0x203   :  { %4857 = vst [vmem:[#allocation14_spill] sm:$0xff] %v4637_v2  ;;  %v4639_v62 = vpop.f32.mrf.mxu0 }
 0x204   :  { %4858 = vst [vmem:[#allocation16_spill] sm:$0xff] %v4639_v62  ;;  %v4641_v36 = vpop.f32.mrf.mxu1 }
 0x205   :  { %4859 = vst [vmem:[#allocation15_spill] sm:$0xff] %v4641_v36  ;;  %v4643_v48 = vpop.f32.mrf.mxu0 }
 0x206   :  { %4860 = vst [vmem:[#allocation12_spill] sm:$0xff] %v4643_v48  ;;  %v4645_v57 = vpop.f32.mrf.mxu1 }
 0x207   :  { %4861 = vst [vmem:[#allocation13_spill] sm:$0xff] %v4645_v57  ;;  %v4647_v35 = vpop.f32.mrf.mxu0  ;;  %v2671_v57 = vadd.f32 %v4587_v58, %v4682_v52 }
 0x208   :  { %4862 = vst [vmem:[#allocation17_spill] sm:$0xff] %v4647_v35  ;;  %v4649_v38 = vpop.f32.mrf.mxu1 }
 0x209   :  { %4863 = vst [vmem:[#allocation18_spill] sm:$0xff] %v4649_v38  ;;  %v2710_v41 = vpop.f32.mrf.mxu0  ;;  %v2784_v58 = vadd.f32 %v4589_v23, %v2671_v57  ;;  %v2681_v23 = vadd.f32 %v4603_v31, %v4682_v52 }
 0x20a   :  { %v2823_v15 = vpop.f32.mrf.mxu1  ;;  %v2711_v35 = vadd.f32 %v2710_v41, %v4682_v52 }
 0x20b   :  { %v2712_v6 = vpop.f32.mrf.mxu0 }
 0x20c   :  { %v2825_v27 = vpop.f32.mrf.mxu1  ;;  %v2713_v61 = vadd.f32 %v2712_v6, %v4685_v1  ;;  %v2824_v2 = vadd.f32 %v2823_v15, %v2711_v35 }
 0x20d   :  { %v2714_v12 = vpop.f32.mrf.mxu0 }
 0x20e   :  { %v2827_v22 = vpop.f32.mrf.mxu1  ;;  %v2715_v41 = vadd.f32 %v2714_v12, %v4682_v52  ;;  %v2826_v6 = vadd.f32 %v2825_v27, %v2713_v61 }
 0x20f   :  { %v2716_v39 = vpop.f32.mrf.mxu0 }
 0x210   :  { %v2829_v25 = vpop.f32.mrf.mxu1  ;;  %v2828_v15 = vadd.f32 %v2827_v22, %v2715_v41  ;;  %v2691_v41 = vadd.f32 %v4619_v10, %v4682_v52 }
 0x211   :  { %v2720_v18 = vpop.f32.mrf.mxu0 }
 0x212   :  { %v4651_v20 = vpop.f32.mrf.mxu1  ;;  %v2721_v24 = vadd.f32 %v2720_v18, %v4682_v52  ;;  %v2794_v18 = vadd.f32 %v4605_v54, %v2681_v23  ;;  %v2693_v23 = vadd.f32 %v4623_v37, %v4685_v1 }
 0x213   :  { %v2722_v42 = vpop.f32.mrf.mxu0 }
 0x214   :  { %v4653_v49 = vpop.f32.mrf.mxu1 }
 0x215   :  { %v4655_v16 = vpop.f32.mrf.mxu0 }
 0x216   :  { %v4657_v26 = vpop.f32.mrf.mxu1 }
 0x217   :  { %v4659_v8 = vpop.f32.mrf.mxu0 }
 0x218   :  { %v4661_v59 = vpop.f32.mrf.mxu1  ;;  %v2727_v61 = vadd.f32 %v4659_v8, %v4685_v1 }
 0x219   :  { %v4663_v9 = vpop.f32.mrf.mxu0 }
 0x21a   :  { %v4665_v32 = vpop.f32.mrf.mxu1  ;;  %v2840_v10 = vadd.f32 %v4661_v59, %v2727_v61 }
 0x21b   :  { %v4667_v50 = vpop.f32.mrf.mxu0 }
 0x21c   :  { %v4669_v3 = vpop.f32.mrf.mxu1 }
 0x21d   :  { %v4673_v34 = vpop.f32.mrf.mxu0 }
 0x21e   :  { %v4675_v17 = vpop.f32.mrf.mxu1 }
 0x21f   :  { %v4677_v11 = vpop.f32.mrf.mxu0 }
 0x220   :  { %v4679_v53 = vpop.f32.mrf.mxu1 }
 0x221   :  { %4864 = vst [vmem:[#allocation20_spill] sm:$0xff] %v4679_v53  ;;  %v4687_v55 = vpop.f32.mrf.mxu0  ;;  %v2717_v53 = vadd.f32 %v2716_v39, %v4685_v1  ;;  %v2683_v39 = vadd.f32 %v4607_v4, %v4685_v1  ;;  %v2725_v4 = vadd.f32 %v4655_v16, %v4682_v52 }
 0x222   :  { %v4689_v43 = vpop.f32.mrf.mxu1 }
 0x223   :  { %4865 = vst [vmem:[#allocation19_spill] sm:$0xff] %v4689_v43  ;;  %v4691_v38 = vpop.f32.mrf.mxu0  ;;  %v2675_v43 = vadd.f32 %v4595_v13, %v4682_v52 }
 0x224   :  { %4866 = vst [vmem:[#allocation21_spill] sm:$0xff] %v4691_v38  ;;  %v4693_v28 = vpop.f32.mrf.mxu1 }
 0x225   :  { %4867 = vst [vmem:[#allocation23_spill] sm:$0xff] %v4693_v28  ;;  %v4700_v36 = vpop.f32.mrf.mxu0 }
 0x226   :  { %4868 = vst [vmem:[#allocation22_spill] sm:$0xff] %v4700_v36  ;;  %v4702_v63 = vpop.f32.mrf.mxu1  ;;  %v2677_v36 = vadd.f32 %v4599_v7, %v4685_v1 }
 0x227   :  { %4869 = vst [vmem:[#allocation25_spill] sm:$0xff] %v4702_v63  ;;  %v4707_v48 = vpop.f32.mrf.mxu0 }
 0x228   :  { %4870 = vst [vmem:[#allocation24_spill] sm:$0xff] %v4707_v48  ;;  %v4709_v28 = vpop.f32.mrf.mxu1  ;;  %v2788_v48 = vadd.f32 %v4597_v45, %v2675_v43  ;;  %v2790_v27 = vadd.f32 %v4601_v21, %v2677_v36  ;;  %v2830_v45 = vadd.f32 %v2829_v25, %v2717_v53  ;;  %v2723_v43 = vadd.f32 %v2722_v42, %v4685_v1 }
 0x229   :  { %v2896_v63 = vpop.f32.mrf.mxu0  ;;  %v2834_v21 = vadd.f32 %v4651_v20, %v2721_v24  ;;  %v2796_v42 = vadd.f32 %v4609_v47, %v2683_v39  ;;  %v2695_v24 = vadd.f32 %v4627_v5, %v4682_v52  ;;  %v2697_v39 = vadd.f32 %v4631_v33, %v4685_v1 }
 0x22a   :  { %v2936_v38 = vpop.f32.mrf.mxu1  ;;  %v2897_v13 = vadd.f32 %v2896_v63, %v2784_v58 }
 0x22b   :  { %v2937_v62 = vadd.f32 %v2936_v38, %v2824_v2  ;;  %v2898_v57 = vpop.f32.mrf.mxu0 }
 0x22c   :  { %v2938_v35 = vpop.f32.mrf.mxu1  ;;  %2979 = vst [vmem:[#allocation8 + $0x20] sm:$0xff] %v2897_v13  ;;  %v2899_v7 = vadd.f32 %v2898_v57, %v2786_v0 }
 0x22d   :  { %3027 = vst [vmem:[#allocation8 + $0x1a0] sm:$0xff] %v2937_v62  ;;  %v2939_v12 = vadd.f32 %v2938_v35, %v2826_v6  ;;  %v2900_v2 = vpop.f32.mrf.mxu0  ;;  %v2685_v62 = vadd.f32 %v4611_v44, %v4682_v52  ;;  %v2836_v44 = vadd.f32 %v4653_v49, %v2723_v43  ;;  %v2731_v6 = vadd.f32 %v4663_v9, %v4682_v52 }
 0x22e   :  { %v2940_v38 = vpop.f32.mrf.mxu1  ;;  %2980 = vst [vmem:[#allocation8 + $0x28] sm:$0xff] %v2899_v7  ;;  %v2901_v31 = vadd.f32 %v2900_v2, %v2788_v48  ;;  %v2687_v48 = vadd.f32 %v4615_v30, %v4685_v1  ;;  %v2838_v30 = vadd.f32 %v4657_v26, %v2725_v4  ;;  %v2733_v35 = vadd.f32 %v4667_v50, %v4685_v1  ;;  %v4873_v4 = vld [vmem:[#allocation21_spill] sm:$0xff] }
 0x22f   :  { %3028 = vst [vmem:[#allocation8 + $0x1a8] sm:$0xff] %v2939_v12  ;;  %v2941_v22 = vadd.f32 %v2940_v38, %v2828_v15  ;;  %v2902_v40 = vpop.f32.mrf.mxu0  ;;  %v2798_v58 = vadd.f32 %v4613_v60, %v2685_v62  ;;  %v2804_v15 = vadd.f32 %v4621_v51, %v2691_v41  ;;  %v2844_v37 = vadd.f32 %v4665_v32, %v2731_v6  ;;  %v4871_v62 = vld [vmem:[#allocation16_spill] sm:$0xff] }
 0x230   :  { %v2942_v63 = vpop.f32.mrf.mxu1  ;;  %2985 = vst [vmem:[#allocation8 + $0x50] sm:$0xff] %v2901_v31  ;;  %v2903_v36 = vadd.f32 %v2902_v40, %v2790_v27  ;;  %v2800_v13 = vadd.f32 %v4617_v46, %v2687_v48  ;;  %v2735_v12 = vadd.f32 %v4673_v34, %v4682_v52  ;;  %v2806_v27 = vadd.f32 %v4625_v14, %v2693_v23  ;;  %v4875_v48 = vld [vmem:[#allocation12_spill] sm:$0xff] }
 0x231   :  { %3033 = vst [vmem:[#allocation8 + $0x1d0] sm:$0xff] %v2941_v22  ;;  %v2943_v25 = vadd.f32 %v2942_v63, %v2830_v45  ;;  %v2906_v54 = vpop.f32.mrf.mxu0  ;;  %v2846_v5 = vadd.f32 %v4669_v3, %v2733_v35  ;;  %v2737_v38 = vadd.f32 %v4677_v11, %v4685_v1  ;;  %v2808_v45 = vadd.f32 %v4629_v19, %v2695_v24  ;;  %v4883_v24 = vld [vmem:[#allocation25_spill] sm:$0xff] }
 0x232   :  { %v2946_v53 = vpop.f32.mrf.mxu1  ;;  %2986 = vst [vmem:[#allocation8 + $0x58] sm:$0xff] %v2903_v36  ;;  %v2907_v20 = vadd.f32 %v2906_v54, %v2794_v18  ;;  %v2701_v43 = vadd.f32 %v4635_v56, %v4682_v52  ;;  %v2848_v33 = vadd.f32 %v4675_v17, %v2735_v12  ;;  %v2741_v22 = vadd.f32 %v4687_v55, %v4682_v52 }
 0x233   :  { %3034 = vst [vmem:[#allocation8 + $0x1d8] sm:$0xff] %v2943_v25  ;;  %v2947_v16 = vadd.f32 %v2946_v53, %v2834_v21  ;;  %v2908_v47 = vpop.f32.mrf.mxu0  ;;  %v2810_v18 = vadd.f32 %v4633_v29, %v2697_v39  ;;  %v2703_v40 = vadd.f32 %v4871_v62, %v4685_v1  ;;  %v4872_v21 = vld [vmem:[#allocation20_spill] sm:$0xff]  ;;  %v2743_v36 = vadd.f32 %v4873_v4, %v4685_v1  ;;  %v4874_v25 = vld [vmem:[#allocation14_spill] sm:$0xff] }
 0x234   :  { %v2948_v0 = vpop.f32.mrf.mxu1  ;;  %2991 = vst [vmem:[#allocation8 + $0x80] sm:$0xff] %v2907_v20  ;;  %v2909_v49 = vadd.f32 %v2908_v47, %v2796_v42  ;;  %v2850_v56 = vadd.f32 %v4872_v21, %v2737_v38  ;;  %v2814_v42 = vadd.f32 %v4874_v25, %v2701_v43  ;;  %v2705_v54 = vadd.f32 %v4875_v48, %v4682_v52  ;;  %v4877_v20 = vld [vmem:[#allocation22_spill] sm:$0xff]  ;;  %v4878_v47 = vld [vmem:[#allocation15_spill] sm:$0xff] }
 0x235   :  { %3039 = vst [vmem:[#allocation8 + $0x200] sm:$0xff] %v2947_v16  ;;  %v2949_v8 = vadd.f32 %v2948_v0, %v2836_v44  ;;  %v2910_v60 = vpop.f32.mrf.mxu0  ;;  %v4876_v44 = vld [vmem:[#allocation19_spill] sm:$0xff]  ;;  %v2745_v16 = vadd.f32 %v4877_v20, %v4682_v52  ;;  %v2816_v0 = vadd.f32 %v4878_v47, %v2703_v40 }
 0x236   :  { %v2950_v57 = vpop.f32.mrf.mxu1  ;;  %2992 = vst [vmem:[#allocation8 + $0x88] sm:$0xff] %v2909_v49  ;;  %v2911_v26 = vadd.f32 %v2910_v60, %v2798_v58  ;;  %v2854_v61 = vadd.f32 %v4876_v44, %v2741_v22  ;;  %v4881_v60 = vld [vmem:[#allocation24_spill] sm:$0xff] }
 0x237   :  { %3040 = vst [vmem:[#allocation8 + $0x208] sm:$0xff] %v2949_v8  ;;  %v2951_v9 = vadd.f32 %v2950_v57, %v2838_v30  ;;  %v2912_v46 = vpop.f32.mrf.mxu0  ;;  %v4879_v30 = vld [vmem:[#allocation17_spill] sm:$0xff]  ;;  %v2747_v57 = vadd.f32 %v4881_v60, %v4685_v1 }
 0x238   :  { %v2952_v7 = vpop.f32.mrf.mxu1  ;;  %2997 = vst [vmem:[#allocation8 + $0xb0] sm:$0xff] %v2911_v26  ;;  %v2913_v59 = vadd.f32 %v2912_v46, %v2800_v13  ;;  %v2707_v6 = vadd.f32 %v4879_v30, %v4685_v1  ;;  %v4880_v13 = vld [vmem:[#allocation23_spill] sm:$0xff]  ;;  %v2858_v46 = vadd.f32 %v4883_v24, %v2745_v16 }
 0x239   :  { %3045 = vst [vmem:[#allocation8 + $0x230] sm:$0xff] %v2951_v9  ;;  %v2953_v50 = vadd.f32 %v2952_v7, %v2840_v10  ;;  %v2916_v51 = vpop.f32.mrf.mxu0  ;;  %v2856_v23 = vadd.f32 %v4880_v13, %v2743_v36  ;;  %v4882_v9 = vld [vmem:[#allocation13_spill] sm:$0xff] }
 0x23a   :  { %v2956_v2 = vpop.f32.mrf.mxu1  ;;  %2998 = vst [vmem:[#allocation8 + $0xb8] sm:$0xff] %v2913_v59  ;;  %v2917_v32 = vadd.f32 %v2916_v51, %v2804_v15  ;;  %v2818_v15 = vadd.f32 %v4882_v9, %v2705_v54 }
 0x23b   :  { %3046 = vst [vmem:[#allocation8 + $0x238] sm:$0xff] %v2953_v50  ;;  %v2957_v34 = vadd.f32 %v2956_v2, %v2844_v37  ;;  %v2918_v14 = vpop.f32.mrf.mxu0  ;;  %v4884_v50 = vld [vmem:[#allocation18_spill] sm:$0xff] }
 0x23c   :  { %v2958_v31 = vpop.f32.mrf.mxu1  ;;  %3003 = vst [vmem:[#allocation8 + $0xe0] sm:$0xff] %v2917_v32  ;;  %v2919_v3 = vadd.f32 %v2918_v14, %v2806_v27  ;;  %v2820_v1 = vadd.f32 %v4884_v50, %v2707_v6  ;;  %v2860_v27 = vadd.f32 %v4709_v28, %v2747_v57 }
 0x23d   :  { %3051 = vst [vmem:[#allocation8 + $0x260] sm:$0xff] %v2957_v34  ;;  %v2959_v11 = vadd.f32 %v2958_v31, %v2846_v5  ;;  %v2920_v19 = vpop.f32.mrf.mxu0 }
 0x23e   :  { %v2960_v63 = vpop.f32.mrf.mxu1  ;;  %3004 = vst [vmem:[#allocation8 + $0xe8] sm:$0xff] %v2919_v3  ;;  %v2921_v17 = vadd.f32 %v2920_v19, %v2808_v45 }
 0x23f   :  { %3052 = vst [vmem:[#allocation8 + $0x268] sm:$0xff] %v2959_v11  ;;  %v2961_v55 = vadd.f32 %v2960_v63, %v2848_v33  ;;  %v2922_v29 = vpop.f32.mrf.mxu0 }
 0x240   :  { %v2962_v53 = vpop.f32.mrf.mxu1  ;;  %3009 = vst [vmem:[#allocation8 + $0x110] sm:$0xff] %v2921_v17  ;;  %v2923_v58 = vadd.f32 %v2922_v29, %v2810_v18 }
 0x241   :  { %3057 = vst [vmem:[#allocation8 + $0x290] sm:$0xff] %v2961_v55  ;;  %v2963_v41 = vadd.f32 %v2962_v53, %v2850_v56  ;;  %v2926_v49 = vpop.f32.mrf.mxu0 }
 0x242   :  { %v2966_v8 = vpop.f32.mrf.mxu1  ;;  %3010 = vst [vmem:[#allocation8 + $0x118] sm:$0xff] %v2923_v58  ;;  %v2927_v10 = vadd.f32 %v2926_v49, %v2814_v42 }
 0x243   :  { %3058 = vst [vmem:[#allocation8 + $0x298] sm:$0xff] %v2963_v41  ;;  %v2967_v52 = vadd.f32 %v2966_v8, %v2854_v61  ;;  %v2928_v35 = vpop.f32.mrf.mxu0 }
 0x244   :  { %v2968_v26 = vpop.f32.mrf.mxu1  ;;  %3015 = vst [vmem:[#allocation8 + $0x140] sm:$0xff] %v2927_v10  ;;  %v2929_v7 = vadd.f32 %v2928_v35, %v2816_v0 }
 0x245   :  { %3063 = vst [vmem:[#allocation8 + $0x2c0] sm:$0xff] %v2967_v52  ;;  %v2969_v37 = vadd.f32 %v2968_v26, %v2856_v23  ;;  %v2930_v12 = vpop.f32.mrf.mxu0 }
 0x246   :  { %v2970_v59 = vpop.f32.mrf.mxu1  ;;  %3016 = vst [vmem:[#allocation8 + $0x148] sm:$0xff] %v2929_v7  ;;  %v2931_v39 = vadd.f32 %v2930_v12, %v2818_v15 }
 0x247   :  { %3064 = vst [vmem:[#allocation8 + $0x2c8] sm:$0xff] %v2969_v37  ;;  %v2971_v51 = vadd.f32 %v2970_v59, %v2858_v46  ;;  %v2932_v2 = vpop.f32.mrf.mxu0 }
 0x248   :  { %v2972_v5 = vpop.f32.mrf.mxu1  ;;  %3021 = vst [vmem:[#allocation8 + $0x170] sm:$0xff] %v2931_v39  ;;  %v2933_v38 = vadd.f32 %v2932_v2, %v2820_v1 }
 0x249   :  { %3069 = vst [vmem:[#allocation8 + $0x2f0] sm:$0xff] %v2971_v51  ;;  %v2973_v32 = vadd.f32 %v2972_v5, %v2860_v27 }
 0x24a   :  { %3022 = vst [vmem:[#allocation8 + $0x178] sm:$0xff] %v2933_v38 }
 0x24b   :  { %3070 = vst [vmem:[#allocation8 + $0x2f8] sm:$0xff] %v2973_v32 }
 0x24c   :  { %3920 = shalt.err (!%p3917_p5)
}
 0x24d   :  { %3082 = dma.vmem_to_hbm [thread:$0]  %s3077_s2, 12288, %s4798_s3, [#allocation4], %s3939_s22, %s3939_s22, %s3940_s23  }
 0x24e   :  { %3933 = dma.done.wait [#allocation4], 12288  }
 0x24f   :  { %3934 = vsyncadd [#allocation4], 4294955008 }
 0x250   :  { %3086 = vsyncpa [#allocation3], 1 }
 0x251   :  { %3087 = vsyncpa [#allocation6], 1 }
 0x252   :  { %3088 = vsyncpa [#allocation4], 1 }

</bundles_post_ra>
